<compile_context>
chip_gen: v7x
topology: tpu7x:2x2x1
jax: 0.10.0
libtpu: 0.0.40
codegen_flags: <defaults>
</compile_context>

<pallas_src>
import jax
import jax.numpy as jnp
from jax.experimental import pallas as pl
from jax.experimental.pallas import tpu as pltpu


OUT_N_PAD = 8     # 2 -> 8 : one vreg sublane-group of output lanes; wrapper slices [:, :2]


# ----------------------------------------------------------------------------
# Pallas kernel: fused FineTuneModel fusion MLP (screen_features=False branch)
# ----------------------------------------------------------------------------
def finetune_kernel(
    eye_l_ref, eye_r_ref, face_in_ref, grid_in_ref,    # activations (batch-tiled, f32)
    w_eyes_l_ref, w_eyes_r_ref, b_eyes_ref,            # EyesModel.fc  : Linear(256,128)+ReLU (K-split)
    w_face1_ref, b_face1_ref,                          # FaceModel.fc  : Linear(288,128)+ReLU
    w_face2_ref, b_face2_ref,                          #                 Linear(128, 64)+ReLU
    w_grid1_ref, b_grid1_ref,                          # FaceGridModel : Linear(625,256)+ReLU
    w_grid2_ref, b_grid2_ref,                          #                 Linear(256,128)+ReLU
    w_fc1_eyes_ref, w_fc1_face_ref, w_fc1_grid_ref,    # FineTune.fc[0]: Linear(320,128) pre-split
    b_fc1_ref,
    w_fc2_ref, b_fc2_ref,                              # FineTune.fc[2]: Linear(128,2) padded to N=8
    out_ref,
):
    f32 = jnp.float32
    bf16 = jnp.bfloat16

    def relu(v):
        return jnp.maximum(v, 0.0)

    # ---- EyesModel.fc: cat([eye_l, eye_r],1) @ (256,128) + b, ReLU.
    # Concat folded as two full-K matmuls on the pre-split weight halves; f32 accumulation.
    eyes = jnp.dot(eye_l_ref[...].astype(bf16), w_eyes_l_ref[...],
                   preferred_element_type=f32)
    eyes = eyes + jnp.dot(eye_r_ref[...].astype(bf16), w_eyes_r_ref[...],
                          preferred_element_type=f32)
    eyes = relu(eyes + b_eyes_ref[...]).astype(bf16)                      # (TB,128)

    # ---- FaceModel.fc: two Linear+ReLU layers (in-kernel f32->bf16 cast of the input).
    face = jnp.dot(face_in_ref[...].astype(bf16), w_face1_ref[...],
                   preferred_element_type=f32)
    face = relu(face + b_face1_ref[...]).astype(bf16)                     # (TB,128)
    face = jnp.dot(face, w_face2_ref[...], preferred_element_type=f32)
    face = relu(face + b_face2_ref[...]).astype(bf16)                     # (TB,64)

    # ---- FaceGridModel.fc: two Linear+ReLU layers; K=625 left unpadded (Mosaic masks K).
    grd = jnp.dot(grid_in_ref[...].astype(bf16), w_grid1_ref[...],
                  preferred_element_type=f32)
    grd = relu(grd + b_grid1_ref[...]).astype(bf16)                       # (TB,256)
    grd = jnp.dot(grd, w_grid2_ref[...], preferred_element_type=f32)
    grd = relu(grd + b_grid2_ref[...]).astype(bf16)                       # (TB,128)

    # ---- FineTuneModel.fc: cat([eyes, face, grid],1) @ W_fc1 + b, ReLU, Linear(128,2).
    # Concat realized as three full-K matmuls on pre-split weight refs (rows 0:128 /
    # 128:192 / 192:320 of the original (320,128) weight), accumulated in f32.
    h = jnp.dot(eyes, w_fc1_eyes_ref[...], preferred_element_type=f32)
    h = h + jnp.dot(face, w_fc1_face_ref[...], preferred_element_type=f32)
    h = h + jnp.dot(grd, w_fc1_grid_ref[...], preferred_element_type=f32)
    h = relu(h + b_fc1_ref[...]).astype(bf16)                             # (TB,128)

    # Final layer padded only to N=8 -> tiny (TB,8) f32 store; wrapper slices [:, :2].
    out_ref[...] = (jnp.dot(h, w_fc2_ref[...], preferred_element_type=f32)
                    + b_fc2_ref[...])


# ----------------------------------------------------------------------------
# Wrapper: batch-tiled pallas_call with VMEM-resident weights
# ----------------------------------------------------------------------------
def _round_up(x, m):
    return ((x + m - 1) // m) * m


def _choose_tile(B, max_tile=1024):
    """Batch tile selection.

    * Small B: one full-extent block (block dims == array dims, no padding needed).
    * Larger B: at least 2 tiles so the "parallel" batch axis can shard across the
      two v7x TensorCores, tile sized so the ragged last tile wastes little work.
      No wrapper-side batch padding — Pallas clamps the ragged last block.
    """
    if B <= 256:
        return B, 1
    n_tiles = max(2, -(-B // max_tile))
    tb = _round_up(-(-B // n_tiles), 16)
    n_tiles = -(-B // tb)
    return tb, n_tiles


def finetune_forward(eye_l, eye_r, face_feat, grid, kparams, *, max_batch_tile=1024):
    """Fused FineTuneModel fusion MLP. kparams from pack_params().

    Inputs are taken in their producer dtype (f32) and cast to bf16 inside the kernel —
    no wrapper-side concat / pad / cast passes over HBM.
    """
    B = eye_l.shape[0]
    TB, n_tiles = _choose_tile(B, max_batch_tile)

    def act_spec(feat):
        return pl.BlockSpec((TB, feat), lambda i: (i, 0))

    def resident_spec(shape):
        # Weight / bias block: always block (0,0) -> stays in VMEM across all tiles.
        return pl.BlockSpec(shape, lambda i: (0, 0))

    weight_order = (
        "w_eyes_l", "w_eyes_r", "b_eyes",
        "w_face1", "b_face1",
        "w_face2", "b_face2",
        "w_grid1", "b_grid1",
        "w_grid2", "b_grid2",
        "w_fc1_eyes", "w_fc1_face", "w_fc1_grid", "b_fc1",
        "w_fc2", "b_fc2",
    )
    weight_args = tuple(kparams[name] for name in weight_order)

    in_specs = (
        [act_spec(eye_l.shape[1]), act_spec(eye_r.shape[1]),
         act_spec(face_feat.shape[1]), act_spec(grid.shape[1])]
        + [resident_spec(w.shape) for w in weight_args]
    )

    out = pl.pallas_call(
        finetune_kernel,
        out_shape=jax.ShapeDtypeStruct((B, OUT_N_PAD), jnp.float32),
        grid=(n_tiles,),
        in_specs=in_specs,
        out_specs=pl.BlockSpec((TB, OUT_N_PAD), lambda i: (i, 0)),
        compiler_params=pltpu.CompilerParams(
            dimension_semantics=("parallel",),
            vmem_limit_bytes=32 * 1024 * 1024,
        ),
    )(eye_l, eye_r, face_feat, grid, *weight_args)

    return out[:, :2]


# ----------------------------------------------------------------------------
# Parameters
# ----------------------------------------------------------------------------
def init_params(key):
    """PyTorch nn.Linear-style init; weights stored (in_features, out_features)."""
    def linear(key, fan_in, fan_out):
        kw, kb = jax.random.split(key)
        bound = 1.0 / jnp.sqrt(jnp.float32(fan_in))
        w = jax.random.uniform(kw, (fan_in, fan_out), jnp.float32, -bound, bound)
        b = jax.random.uniform(kb, (1, fan_out), jnp.float32, -bound, bound)
        return w, b

    keys = jax.random.split(key, 8)
    p = {}
    p["w_eyes"],  p["b_eyes"]  = linear(keys[0], 2 * 128, 128)         # EyesModel.fc
    p["w_face1"], p["b_face1"] = linear(keys[1], 32 * 3 * 3, 128)      # FaceModel.fc[0]
    p["w_face2"], p["b_face2"] = linear(keys[2], 128, 64)              # FaceModel.fc[2]
    p["w_grid1"], p["b_grid1"] = linear(keys[3], 25 * 25, 256)         # FaceGridModel.fc[0]
    p["w_grid2"], p["b_grid2"] = linear(keys[4], 256, 128)             # FaceGridModel.fc[2]
    p["w_fc1"],   p["b_fc1"]   = linear(keys[5], 128 + 64 + 128, 128)  # FineTune.fc[0]
    p["w_fc2"],   p["b_fc2"]   = linear(keys[6], 128, 2)               # FineTune.fc[2]
    return p


def pack_params(p):
    """Convert reference f32 params to the kernel layout:
    bf16 weights, f32 biases, K-split w_eyes / w_fc1, N-padded (to 8) w_fc2 / b_fc2."""
    bf16 = jnp.bfloat16
    kp = {}
    kp["w_eyes_l"] = p["w_eyes"][0:128, :].astype(bf16)
    kp["w_eyes_r"] = p["w_eyes"][128:256, :].astype(bf16)
    kp["b_eyes"] = p["b_eyes"]
    kp["w_face1"] = p["w_face1"].astype(bf16)
    kp["b_face1"] = p["b_face1"]
    kp["w_face2"] = p["w_face2"].astype(bf16)
    kp["b_face2"] = p["b_face2"]
    kp["w_grid1"] = p["w_grid1"].astype(bf16)           # K=625 kept; Mosaic masks odd K
    kp["b_grid1"] = p["b_grid1"]
    kp["w_grid2"] = p["w_grid2"].astype(bf16)
    kp["b_grid2"] = p["b_grid2"]
    kp["w_fc1_eyes"] = p["w_fc1"][0:128, :].astype(bf16)
    kp["w_fc1_face"] = p["w_fc1"][128:192, :].astype(bf16)
    kp["w_fc1_grid"] = p["w_fc1"][192:320, :].astype(bf16)
    kp["b_fc1"] = p["b_fc1"]
    kp["w_fc2"] = jnp.pad(
        p["w_fc2"], ((0, 0), (0, OUT_N_PAD - p["w_fc2"].shape[1]))).astype(bf16)
    kp["b_fc2"] = jnp.pad(p["b_fc2"], ((0, 0), (0, OUT_N_PAD - p["b_fc2"].shape[1])))
    return kp


# ----------------------------------------------------------------------------
# Pure-JAX reference with matching numerics (bf16 matmul operands, f32 accumulation)
# ----------------------------------------------------------------------------
def finetune_reference(eye_l, eye_r, face_feat, grid, p):
    bf16 = jnp.bfloat16

    def lin(x, w, b):
        return jnp.dot(x.astype(bf16), w.astype(bf16),
                       preferred_element_type=jnp.float32) + b

    relu = lambda v: jnp.maximum(v, 0.0)
    eyes = relu(lin(jnp.concatenate([eye_l, eye_r], axis=1), p["w_eyes"], p["b_eyes"]))
    face = relu(lin(face_feat, p["w_face1"], p["b_face1"]))
    face = relu(lin(face, p["w_face2"], p["b_face2"]))
    g = relu(lin(grid, p["w_grid1"], p["b_grid1"]))
    g = relu(lin(g, p["w_grid2"], p["b_grid2"]))
    x = relu(lin(jnp.concatenate([eyes, face, g], axis=1), p["w_fc1"], p["b_fc1"]))
    return lin(x, p["w_fc2"], p["b_fc2"])


if __name__ == "__main__":
    key = jax.random.PRNGKey(0)
    k_in, k_param = jax.random.split(key)
    k1, k2, k3, k4 = jax.random.split(k_in, 4)

    B = 2
    eye_l_feat = jax.random.normal(k1, (B, 128), jnp.float32)        # post-backbone eye-L features
    eye_r_feat = jax.random.normal(k2, (B, 128), jnp.float32)        # post-backbone eye-R features
    face_feat = jax.random.normal(k3, (B, 32 * 3 * 3), jnp.float32)  # post-backbone face features
    grid = jax.random.uniform(k4, (B, 25 * 25), jnp.float32)         # 25x25 face grid, flattened

    params = init_params(k_param)
    kparams = pack_params(params)

    out = finetune_forward(eye_l_feat, eye_r_feat, face_feat, grid, kparams)
    out = jax.block_until_ready(out)

    ref = finetune_reference(eye_l_feat, eye_r_feat, face_feat, grid, params)
    ref = jax.block_until_ready(ref)

    assert out.shape == (B, 2), out.shape
    assert jnp.allclose(out, ref, atol=2e-3, rtol=2e-3), (out, ref)
    print("KERNEL_OK")
</pallas_src>

<mosaic_0001>
module attributes {stable_mosaic.version = 11 : i64} {
  func.func @finetune_kernel(%arg0: i32, %arg1: memref<2x128xf32, #tpu.memory_space<vmem>>, %arg2: memref<2x128xf32, #tpu.memory_space<vmem>>, %arg3: memref<2x288xf32, #tpu.memory_space<vmem>>, %arg4: memref<2x625xf32, #tpu.memory_space<vmem>>, %arg5: memref<128x128xbf16, #tpu.memory_space<vmem>>, %arg6: memref<128x128xbf16, #tpu.memory_space<vmem>>, %arg7: memref<1x128xf32, #tpu.memory_space<vmem>>, %arg8: memref<288x128xbf16, #tpu.memory_space<vmem>>, %arg9: memref<1x128xf32, #tpu.memory_space<vmem>>, %arg10: memref<128x64xbf16, #tpu.memory_space<vmem>>, %arg11: memref<1x64xf32, #tpu.memory_space<vmem>>, %arg12: memref<625x256xbf16, #tpu.memory_space<vmem>>, %arg13: memref<1x256xf32, #tpu.memory_space<vmem>>, %arg14: memref<256x128xbf16, #tpu.memory_space<vmem>>, %arg15: memref<1x128xf32, #tpu.memory_space<vmem>>, %arg16: memref<128x128xbf16, #tpu.memory_space<vmem>>, %arg17: memref<64x128xbf16, #tpu.memory_space<vmem>>, %arg18: memref<128x128xbf16, #tpu.memory_space<vmem>>, %arg19: memref<1x128xf32, #tpu.memory_space<vmem>>, %arg20: memref<128x8xbf16, #tpu.memory_space<vmem>>, %arg21: memref<1x8xf32, #tpu.memory_space<vmem>>, %arg22: memref<2x8xf32, #tpu.memory_space<vmem>>) attributes {dimension_semantics = [#tpu.dimension_semantics<parallel>], iteration_bounds = array<i64: 1>, scalar_prefetch = 0 : i64, scratch_operands = 0 : i64, tpu.core_type = #tpu.core_type<tc>, window_params = [{transform_indices = @transform_0, window_bounds = array<i64: 2, 128>}, {transform_indices = @transform_1, window_bounds = array<i64: 2, 128>}, {transform_indices = @transform_2, window_bounds = array<i64: 2, 288>}, {transform_indices = @transform_3, window_bounds = array<i64: 2, 625>}, {pipeline_mode = #tpu.pipeline_mode<synchronous>, transform_indices = @transform_4, window_bounds = array<i64: 128, 128>}, {pipeline_mode = #tpu.pipeline_mode<synchronous>, transform_indices = @transform_5, window_bounds = array<i64: 128, 128>}, {pipeline_mode = #tpu.pipeline_mode<synchronous>, transform_indices = @transform_6, window_bounds = array<i64: 1, 128>}, {pipeline_mode = #tpu.pipeline_mode<synchronous>, transform_indices = @transform_7, window_bounds = array<i64: 288, 128>}, {pipeline_mode = #tpu.pipeline_mode<synchronous>, transform_indices = @transform_8, window_bounds = array<i64: 1, 128>}, {pipeline_mode = #tpu.pipeline_mode<synchronous>, transform_indices = @transform_9, window_bounds = array<i64: 128, 64>}, {pipeline_mode = #tpu.pipeline_mode<synchronous>, transform_indices = @transform_10, window_bounds = array<i64: 1, 64>}, {pipeline_mode = #tpu.pipeline_mode<synchronous>, transform_indices = @transform_11, window_bounds = array<i64: 625, 256>}, {pipeline_mode = #tpu.pipeline_mode<synchronous>, transform_indices = @transform_12, window_bounds = array<i64: 1, 256>}, {pipeline_mode = #tpu.pipeline_mode<synchronous>, transform_indices = @transform_13, window_bounds = array<i64: 256, 128>}, {pipeline_mode = #tpu.pipeline_mode<synchronous>, transform_indices = @transform_14, window_bounds = array<i64: 1, 128>}, {pipeline_mode = #tpu.pipeline_mode<synchronous>, transform_indices = @transform_15, window_bounds = array<i64: 128, 128>}, {pipeline_mode = #tpu.pipeline_mode<synchronous>, transform_indices = @transform_16, window_bounds = array<i64: 64, 128>}, {pipeline_mode = #tpu.pipeline_mode<synchronous>, transform_indices = @transform_17, window_bounds = array<i64: 128, 128>}, {pipeline_mode = #tpu.pipeline_mode<synchronous>, transform_indices = @transform_18, window_bounds = array<i64: 1, 128>}, {pipeline_mode = #tpu.pipeline_mode<synchronous>, transform_indices = @transform_19, window_bounds = array<i64: 128, 8>}, {pipeline_mode = #tpu.pipeline_mode<synchronous>, transform_indices = @transform_20, window_bounds = array<i64: 1, 8>}, {transform_indices = @transform_21, window_bounds = array<i64: 2, 8>}]} {
    %c0 = arith.constant 0 : index
    %c0_0 = arith.constant 0 : index
    %0 = vector.load %arg1[%c0, %c0_0] : memref<2x128xf32, #tpu.memory_space<vmem>>, vector<2x128xf32>
    %1 = arith.truncf %0 : vector<2x128xf32> to vector<2x128xbf16>
    %c0_1 = arith.constant 0 : index
    %c0_2 = arith.constant 0 : index
    %2 = vector.load %arg5[%c0_1, %c0_2] : memref<128x128xbf16, #tpu.memory_space<vmem>>, vector<128x128xbf16>
    %cst = arith.constant dense<0.000000e+00> : vector<2x128xf32>
    %3 = tpu.matmul %1, %2, %cst {dimension_numbers = #tpu.dot_dimension_numbers<[1], [0], [0], [1], [0, 0, 1, 1], [], []>} : vector<2x128xbf16>, vector<128x128xbf16>, vector<2x128xf32> -> vector<2x128xf32>
    %c0_3 = arith.constant 0 : index
    %c0_4 = arith.constant 0 : index
    %4 = vector.load %arg2[%c0_3, %c0_4] : memref<2x128xf32, #tpu.memory_space<vmem>>, vector<2x128xf32>
    %5 = arith.truncf %4 : vector<2x128xf32> to vector<2x128xbf16>
    %c0_5 = arith.constant 0 : index
    %c0_6 = arith.constant 0 : index
    %6 = vector.load %arg6[%c0_5, %c0_6] : memref<128x128xbf16, #tpu.memory_space<vmem>>, vector<128x128xbf16>
    %cst_7 = arith.constant dense<0.000000e+00> : vector<2x128xf32>
    %7 = tpu.matmul %5, %6, %cst_7 {dimension_numbers = #tpu.dot_dimension_numbers<[1], [0], [0], [1], [0, 0, 1, 1], [], []>} : vector<2x128xbf16>, vector<128x128xbf16>, vector<2x128xf32> -> vector<2x128xf32>
    %8 = arith.addf %3, %7 : vector<2x128xf32>
    %c0_8 = arith.constant 0 : index
    %c0_9 = arith.constant 0 : index
    %9 = vector.load %arg7[%c0_8, %c0_9] : memref<1x128xf32, #tpu.memory_space<vmem>>, vector<1x128xf32>
    %10 = vector.broadcast %9 : vector<1x128xf32> to vector<2x128xf32>
    %11 = arith.addf %8, %10 : vector<2x128xf32>
    %cst_10 = arith.constant 0.000000e+00 : f32
    %12 = vector.broadcast %cst_10 : f32 to vector<2x128xf32>
    %13 = arith.maximumf %11, %12 : vector<2x128xf32>
    %14 = arith.truncf %13 : vector<2x128xf32> to vector<2x128xbf16>
    %c0_11 = arith.constant 0 : index
    %c0_12 = arith.constant 0 : index
    %15 = vector.load %arg3[%c0_11, %c0_12] : memref<2x288xf32, #tpu.memory_space<vmem>>, vector<2x288xf32>
    %16 = arith.truncf %15 : vector<2x288xf32> to vector<2x288xbf16>
    %c0_13 = arith.constant 0 : index
    %c0_14 = arith.constant 0 : index
    %17 = vector.load %arg8[%c0_13, %c0_14] : memref<288x128xbf16, #tpu.memory_space<vmem>>, vector<288x128xbf16>
    %cst_15 = arith.constant dense<0.000000e+00> : vector<2x128xf32>
    %18 = tpu.matmul %16, %17, %cst_15 {dimension_numbers = #tpu.dot_dimension_numbers<[1], [0], [0], [1], [0, 0, 1, 1], [], []>} : vector<2x288xbf16>, vector<288x128xbf16>, vector<2x128xf32> -> vector<2x128xf32>
    %c0_16 = arith.constant 0 : index
    %c0_17 = arith.constant 0 : index
    %19 = vector.load %arg9[%c0_16, %c0_17] : memref<1x128xf32, #tpu.memory_space<vmem>>, vector<1x128xf32>
    %20 = vector.broadcast %19 : vector<1x128xf32> to vector<2x128xf32>
    %21 = arith.addf %18, %20 : vector<2x128xf32>
    %cst_18 = arith.constant 0.000000e+00 : f32
    %22 = vector.broadcast %cst_18 : f32 to vector<2x128xf32>
    %23 = arith.maximumf %21, %22 : vector<2x128xf32>
    %24 = arith.truncf %23 : vector<2x128xf32> to vector<2x128xbf16>
    %c0_19 = arith.constant 0 : index
    %c0_20 = arith.constant 0 : index
    %25 = vector.load %arg10[%c0_19, %c0_20] : memref<128x64xbf16, #tpu.memory_space<vmem>>, vector<128x64xbf16>
    %cst_21 = arith.constant dense<0.000000e+00> : vector<2x64xf32>
    %26 = tpu.matmul %24, %25, %cst_21 {dimension_numbers = #tpu.dot_dimension_numbers<[1], [0], [0], [1], [0, 0, 1, 1], [], []>} : vector<2x128xbf16>, vector<128x64xbf16>, vector<2x64xf32> -> vector<2x64xf32>
    %c0_22 = arith.constant 0 : index
    %c0_23 = arith.constant 0 : index
    %27 = vector.load %arg11[%c0_22, %c0_23] : memref<1x64xf32, #tpu.memory_space<vmem>>, vector<1x64xf32>
    %28 = vector.broadcast %27 : vector<1x64xf32> to vector<2x64xf32>
    %29 = arith.addf %26, %28 : vector<2x64xf32>
    %cst_24 = arith.constant 0.000000e+00 : f32
    %30 = vector.broadcast %cst_24 : f32 to vector<2x64xf32>
    %31 = arith.maximumf %29, %30 : vector<2x64xf32>
    %32 = arith.truncf %31 : vector<2x64xf32> to vector<2x64xbf16>
    %c0_25 = arith.constant 0 : index
    %c0_26 = arith.constant 0 : index
    %33 = vector.load %arg4[%c0_25, %c0_26] : memref<2x625xf32, #tpu.memory_space<vmem>>, vector<2x625xf32>
    %34 = arith.truncf %33 : vector<2x625xf32> to vector<2x625xbf16>
    %c0_27 = arith.constant 0 : index
    %c0_28 = arith.constant 0 : index
    %35 = vector.load %arg12[%c0_27, %c0_28] : memref<625x256xbf16, #tpu.memory_space<vmem>>, vector<625x256xbf16>
    %cst_29 = arith.constant dense<0.000000e+00> : vector<2x256xf32>
    %36 = tpu.matmul %34, %35, %cst_29 {dimension_numbers = #tpu.dot_dimension_numbers<[1], [0], [0], [1], [0, 0, 1, 1], [], []>} : vector<2x625xbf16>, vector<625x256xbf16>, vector<2x256xf32> -> vector<2x256xf32>
    %c0_30 = arith.constant 0 : index
    %c0_31 = arith.constant 0 : index
    %37 = vector.load %arg13[%c0_30, %c0_31] : memref<1x256xf32, #tpu.memory_space<vmem>>, vector<1x256xf32>
    %38 = vector.broadcast %37 : vector<1x256xf32> to vector<2x256xf32>
    %39 = arith.addf %36, %38 : vector<2x256xf32>
    %cst_32 = arith.constant 0.000000e+00 : f32
    %40 = vector.broadcast %cst_32 : f32 to vector<2x256xf32>
    %41 = arith.maximumf %39, %40 : vector<2x256xf32>
    %42 = arith.truncf %41 : vector<2x256xf32> to vector<2x256xbf16>
    %c0_33 = arith.constant 0 : index
    %c0_34 = arith.constant 0 : index
    %43 = vector.load %arg14[%c0_33, %c0_34] : memref<256x128xbf16, #tpu.memory_space<vmem>>, vector<256x128xbf16>
    %cst_35 = arith.constant dense<0.000000e+00> : vector<2x128xf32>
    %44 = tpu.matmul %42, %43, %cst_35 {dimension_numbers = #tpu.dot_dimension_numbers<[1], [0], [0], [1], [0, 0, 1, 1], [], []>} : vector<2x256xbf16>, vector<256x128xbf16>, vector<2x128xf32> -> vector<2x128xf32>
    %c0_36 = arith.constant 0 : index
    %c0_37 = arith.constant 0 : index
    %45 = vector.load %arg15[%c0_36, %c0_37] : memref<1x128xf32, #tpu.memory_space<vmem>>, vector<1x128xf32>
    %46 = vector.broadcast %45 : vector<1x128xf32> to vector<2x128xf32>
    %47 = arith.addf %44, %46 : vector<2x128xf32>
    %cst_38 = arith.constant 0.000000e+00 : f32
    %48 = vector.broadcast %cst_38 : f32 to vector<2x128xf32>
    %49 = arith.maximumf %47, %48 : vector<2x128xf32>
    %50 = arith.truncf %49 : vector<2x128xf32> to vector<2x128xbf16>
    %c0_39 = arith.constant 0 : index
    %c0_40 = arith.constant 0 : index
    %51 = vector.load %arg16[%c0_39, %c0_40] : memref<128x128xbf16, #tpu.memory_space<vmem>>, vector<128x128xbf16>
    %cst_41 = arith.constant dense<0.000000e+00> : vector<2x128xf32>
    %52 = tpu.matmul %14, %51, %cst_41 {dimension_numbers = #tpu.dot_dimension_numbers<[1], [0], [0], [1], [0, 0, 1, 1], [], []>} : vector<2x128xbf16>, vector<128x128xbf16>, vector<2x128xf32> -> vector<2x128xf32>
    %c0_42 = arith.constant 0 : index
    %c0_43 = arith.constant 0 : index
    %53 = vector.load %arg17[%c0_42, %c0_43] : memref<64x128xbf16, #tpu.memory_space<vmem>>, vector<64x128xbf16>
    %cst_44 = arith.constant dense<0.000000e+00> : vector<2x128xf32>
    %54 = tpu.matmul %32, %53, %cst_44 {dimension_numbers = #tpu.dot_dimension_numbers<[1], [0], [0], [1], [0, 0, 1, 1], [], []>} : vector<2x64xbf16>, vector<64x128xbf16>, vector<2x128xf32> -> vector<2x128xf32>
    %55 = arith.addf %52, %54 : vector<2x128xf32>
    %c0_45 = arith.constant 0 : index
    %c0_46 = arith.constant 0 : index
    %56 = vector.load %arg18[%c0_45, %c0_46] : memref<128x128xbf16, #tpu.memory_space<vmem>>, vector<128x128xbf16>
    %cst_47 = arith.constant dense<0.000000e+00> : vector<2x128xf32>
    %57 = tpu.matmul %50, %56, %cst_47 {dimension_numbers = #tpu.dot_dimension_numbers<[1], [0], [0], [1], [0, 0, 1, 1], [], []>} : vector<2x128xbf16>, vector<128x128xbf16>, vector<2x128xf32> -> vector<2x128xf32>
    %58 = arith.addf %55, %57 : vector<2x128xf32>
    %c0_48 = arith.constant 0 : index
    %c0_49 = arith.constant 0 : index
    %59 = vector.load %arg19[%c0_48, %c0_49] : memref<1x128xf32, #tpu.memory_space<vmem>>, vector<1x128xf32>
    %60 = vector.broadcast %59 : vector<1x128xf32> to vector<2x128xf32>
    %61 = arith.addf %58, %60 : vector<2x128xf32>
    %cst_50 = arith.constant 0.000000e+00 : f32
    %62 = vector.broadcast %cst_50 : f32 to vector<2x128xf32>
    %63 = arith.maximumf %61, %62 : vector<2x128xf32>
    %64 = arith.truncf %63 : vector<2x128xf32> to vector<2x128xbf16>
    %c0_51 = arith.constant 0 : index
    %c0_52 = arith.constant 0 : index
    %65 = vector.load %arg20[%c0_51, %c0_52] : memref<128x8xbf16, #tpu.memory_space<vmem>>, vector<128x8xbf16>
    %cst_53 = arith.constant dense<0.000000e+00> : vector<2x8xf32>
    %66 = tpu.matmul %64, %65, %cst_53 {dimension_numbers = #tpu.dot_dimension_numbers<[1], [0], [0], [1], [0, 0, 1, 1], [], []>} : vector<2x128xbf16>, vector<128x8xbf16>, vector<2x8xf32> -> vector<2x8xf32>
    %c0_54 = arith.constant 0 : index
    %c0_55 = arith.constant 0 : index
    %67 = vector.load %arg21[%c0_54, %c0_55] : memref<1x8xf32, #tpu.memory_space<vmem>>, vector<1x8xf32>
    %68 = vector.broadcast %67 : vector<1x8xf32> to vector<2x8xf32>
    %69 = arith.addf %66, %68 : vector<2x8xf32>
    %c0_56 = arith.constant 0 : index
    %c0_57 = arith.constant 0 : index
    %70 = vector.load %arg22[%c0_56, %c0_57] : memref<2x8xf32, #tpu.memory_space<vmem>>, vector<2x8xf32>
    tpu.vector_store %arg22[%c0_56, %c0_57], %69 {strides = array<i32>} : memref<2x8xf32, #tpu.memory_space<vmem>>, vector<2x8xf32>,
    return
  }
  func.func @transform_0(%arg0: i32) -> (i32, i32) {
    %c0_i32 = arith.constant 0 : i32
    %c0_i32_0 = arith.constant 0 : i32
    return %arg0, %c0_i32 : i32, i32
  }
  func.func @transform_1(%arg0: i32) -> (i32, i32) {
    %c0_i32 = arith.constant 0 : i32
    %c0_i32_0 = arith.constant 0 : i32
    return %arg0, %c0_i32 : i32, i32
  }
  func.func @transform_2(%arg0: i32) -> (i32, i32) {
    %c0_i32 = arith.constant 0 : i32
    %c0_i32_0 = arith.constant 0 : i32
    return %arg0, %c0_i32 : i32, i32
  }
  func.func @transform_3(%arg0: i32) -> (i32, i32) {
    %c0_i32 = arith.constant 0 : i32
    %c0_i32_0 = arith.constant 0 : i32
    return %arg0, %c0_i32 : i32, i32
  }
  func.func @transform_4(%arg0: i32) -> (i32, i32) {
    %c0_i32 = arith.constant 0 : i32
    %c0_i32_0 = arith.constant 0 : i32
    %c0_i32_1 = arith.constant 0 : i32
    return %c0_i32, %c0_i32_0 : i32, i32
  }
  func.func @transform_5(%arg0: i32) -> (i32, i32) {
    %c0_i32 = arith.constant 0 : i32
    %c0_i32_0 = arith.constant 0 : i32
    %c0_i32_1 = arith.constant 0 : i32
    return %c0_i32, %c0_i32_0 : i32, i32
  }
  func.func @transform_6(%arg0: i32) -> (i32, i32) {
    %c0_i32 = arith.constant 0 : i32
    %c0_i32_0 = arith.constant 0 : i32
    %c0_i32_1 = arith.constant 0 : i32
    return %c0_i32, %c0_i32_0 : i32, i32
  }
  func.func @transform_7(%arg0: i32) -> (i32, i32) {
    %c0_i32 = arith.constant 0 : i32
    %c0_i32_0 = arith.constant 0 : i32
    %c0_i32_1 = arith.constant 0 : i32
    return %c0_i32, %c0_i32_0 : i32, i32
  }
  func.func @transform_8(%arg0: i32) -> (i32, i32) {
    %c0_i32 = arith.constant 0 : i32
    %c0_i32_0 = arith.constant 0 : i32
    %c0_i32_1 = arith.constant 0 : i32
    return %c0_i32, %c0_i32_0 : i32, i32
  }
  func.func @transform_9(%arg0: i32) -> (i32, i32) {
    %c0_i32 = arith.constant 0 : i32
    %c0_i32_0 = arith.constant 0 : i32
    %c0_i32_1 = arith.constant 0 : i32
    return %c0_i32, %c0_i32_0 : i32, i32
  }
  func.func @transform_10(%arg0: i32) -> (i32, i32) {
    %c0_i32 = arith.constant 0 : i32
    %c0_i32_0 = arith.constant 0 : i32
    %c0_i32_1 = arith.constant 0 : i32
    return %c0_i32, %c0_i32_0 : i32, i32
  }
  func.func @transform_11(%arg0: i32) -> (i32, i32) {
    %c0_i32 = arith.constant 0 : i32
    %c0_i32_0 = arith.constant 0 : i32
    %c0_i32_1 = arith.constant 0 : i32
    return %c0_i32, %c0_i32_0 : i32, i32
  }
  func.func @transform_12(%arg0: i32) -> (i32, i32) {
    %c0_i32 = arith.constant 0 : i32
    %c0_i32_0 = arith.constant 0 : i32
    %c0_i32_1 = arith.constant 0 : i32
    return %c0_i32, %c0_i32_0 : i32, i32
  }
  func.func @transform_13(%arg0: i32) -> (i32, i32) {
    %c0_i32 = arith.constant 0 : i32
    %c0_i32_0 = arith.constant 0 : i32
    %c0_i32_1 = arith.constant 0 : i32
    return %c0_i32, %c0_i32_0 : i32, i32
  }
  func.func @transform_14(%arg0: i32) -> (i32, i32) {
    %c0_i32 = arith.constant 0 : i32
    %c0_i32_0 = arith.constant 0 : i32
    %c0_i32_1 = arith.constant 0 : i32
    return %c0_i32, %c0_i32_0 : i32, i32
  }
  func.func @transform_15(%arg0: i32) -> (i32, i32) {
    %c0_i32 = arith.constant 0 : i32
    %c0_i32_0 = arith.constant 0 : i32
    %c0_i32_1 = arith.constant 0 : i32
    return %c0_i32, %c0_i32_0 : i32, i32
  }
  func.func @transform_16(%arg0: i32) -> (i32, i32) {
    %c0_i32 = arith.constant 0 : i32
    %c0_i32_0 = arith.constant 0 : i32
    %c0_i32_1 = arith.constant 0 : i32
    return %c0_i32, %c0_i32_0 : i32, i32
  }
  func.func @transform_17(%arg0: i32) -> (i32, i32) {
    %c0_i32 = arith.constant 0 : i32
    %c0_i32_0 = arith.constant 0 : i32
    %c0_i32_1 = arith.constant 0 : i32
    return %c0_i32, %c0_i32_0 : i32, i32
  }
  func.func @transform_18(%arg0: i32) -> (i32, i32) {
    %c0_i32 = arith.constant 0 : i32
    %c0_i32_0 = arith.constant 0 : i32
    %c0_i32_1 = arith.constant 0 : i32
    return %c0_i32, %c0_i32_0 : i32, i32
  }
  func.func @transform_19(%arg0: i32) -> (i32, i32) {
    %c0_i32 = arith.constant 0 : i32
    %c0_i32_0 = arith.constant 0 : i32
    %c0_i32_1 = arith.constant 0 : i32
    return %c0_i32, %c0_i32_0 : i32, i32
  }
  func.func @transform_20(%arg0: i32) -> (i32, i32) {
    %c0_i32 = arith.constant 0 : i32
    %c0_i32_0 = arith.constant 0 : i32
    %c0_i32_1 = arith.constant 0 : i32
    return %c0_i32, %c0_i32_0 : i32, i32
  }
  func.func @transform_21(%arg0: i32) -> (i32, i32) {
    %c0_i32 = arith.constant 0 : i32
    %c0_i32_0 = arith.constant 0 : i32
    return %arg0, %c0_i32 : i32, i32
  }
}

</mosaic_0001>

<bundles_post_ra>
// kernel: tpu_custom_call.1
= control target key start
LH: loop header
LB: loop body
LE: loop exit
PB: predicated region body
PF: predicated region fallthrough
CT: control target
= control target key end

     0   :  { %s3652_s0 = inlined_call_operand.hbm [shape: f32[2,128], index: 0, kind: input, shape index: {}]   ;;  %s3653_s1 = inlined_call_operand.hbm [shape: f32[2,128], index: 1, kind: input, shape index: {}]   ;;  %s3654_s2 = inlined_call_operand.hbm [shape: f32[2,288], index: 2, kind: input, shape index: {}]   ;;  %s3655_s3 = inlined_call_operand.hbm [shape: f32[2,625], index: 3, kind: input, shape index: {}]   ;;  %s3656_s4 = inlined_call_operand.hbm [shape: bf16[128,128], index: 4, kind: input, shape index: {}]   ;;  %s3657_s5 = inlined_call_operand.hbm [shape: bf16[128,128], index: 5, kind: input, shape index: {}]   ;;  %s3658_s6 = inlined_call_operand.vmem [shape: f32[1,128], index: 6, kind: input, shape index: {}]   ;;  %s3659_s7 = inlined_call_operand.vmem [shape: bf16[288,128], index: 7, kind: input, shape index: {}]   ;;  %s3660_s8 = inlined_call_operand.hbm [shape: f32[1,128], index: 8, kind: input, shape index: {}]   ;;  %s3661_s9 = inlined_call_operand.vmem [shape: bf16[128,64], index: 9, kind: input, shape index: {}]   ;;  %s3662_s10 = inlined_call_operand.hbm [shape: f32[1,64], index: 10, kind: input, shape index: {}]   ;;  %s3663_s11 = inlined_call_operand.hbm [shape: bf16[625,256], index: 11, kind: input, shape index: {}]   ;;  %s3664_s12 = inlined_call_operand.hbm [shape: f32[1,256], index: 12, kind: input, shape index: {}]   ;;  %s3665_s13 = inlined_call_operand.hbm [shape: bf16[256,128], index: 13, kind: input, shape index: {}]   ;;  %s3666_s14 = inlined_call_operand.vmem [shape: f32[1,128], index: 14, kind: input, shape index: {}]   ;;  %s3667_s15 = inlined_call_operand.vmem [shape: bf16[128,128], index: 15, kind: input, shape index: {}]   ;;  %s3668_s16 = inlined_call_operand.hbm [shape: bf16[64,128], index: 16, kind: input, shape index: {}]   ;;  %s3669_s17 = inlined_call_operand.hbm [shape: bf16[128,128], index: 17, kind: input, shape index: {}]   ;;  %s3670_s18 = inlined_call_operand.vmem [shape: f32[1,128], index: 18, kind: input, shape index: {}]   ;;  %s3671_s19 = inlined_call_operand.vmem [shape: bf16[128,8], index: 19, kind: input, shape index: {}]   ;;  %s3672_s20 = inlined_call_operand.vmem [shape: f32[1,8], index: 20, kind: input, shape index: {}]   ;;  %s3673_s21 = inlined_call_operand.hbm [shape: f32[2,8], index: 21, kind: output, shape index: {}]  }
   0x1   :  { %3681 = sst [smem:[#allocation32_spill]] %s3652_s0 }
   0x2   :  { %3682 = sst [smem:[#allocation33_spill]] %s3653_s1 }
   0x3   :  { %3683 = sst [smem:[#allocation34_spill]] %s3654_s2 }
   0x4   :  { %3684 = sst [smem:[#allocation35_spill]] %s3655_s3 }
   0x5   :  { %3685 = sst [smem:[#allocation36_spill]] %s3656_s4 }
   0x6   :  { %3686 = sst [smem:[#allocation37_spill]] %s3657_s5 }
   0x7   :  { %3687 = sst [smem:[#allocation38_spill]] %s3673_s21 }
   0x8   :  { %26 = vsyncpa [#allocation3], 0 }
   0x9   :  { %27 = vsyncpa [#allocation6], 0 }
   0xa   :  { %28 = vsyncpa [#allocation9], 0 }
   0xb   :  { %29 = vsyncpa [#allocation12], 0 }
   0xc   :  { %30 = vsyncpa [#allocation15], 0 }
   0xd   :  { %31 = vsyncpa [#allocation18], 0 }
   0xe   :  { %32 = vsyncpa [#allocation21], 0 }
   0xf   :  { %33 = vsyncpa [#allocation4], 0  ;;  %s3083_s2 = smov [#allocation5]   ;;  %s3084_s26 = smov [#allocation8]  }
  0x10   :  { %s50_s25 = sshll.u32 %s3083_s2, 4  ;;  %s70_s27 = sshll.u32 %s3084_s26, 4  ;;  %s51_s25 = int_to_ptr.vmem [resolvable:$true] %s50_s25  ;;  %s71_s27 = int_to_ptr.vmem [resolvable:$true] %s70_s27 }
  0x11   :  { %s3688_s29 = sld [smem:[#allocation33_spill]] }
  0x17   :  { %s2759_s0 = scalar_lea.hbm %s3688_s29, 32 }
  0x18   :  { %p2760_p0 = scmp.ne.s32.totalorder %s3688_s29, %s2759_s0  ;;  %p2763_p1 = scmp.lt.u32.totalorder %s2759_s0, %s3688_s29 }
  0x1a   :  { %p2765_p2 = pnand %p2763_p1, %p2760_p0 }
  0x1c   :  { %2768 = shalt.err (!%p2765_p2)
}
  0x1d   :  { %s2769_s23 = scalar_lea.vmem %s51_s25, 32  ;;  %p2774_p4 = scmp.lt.s32.totalorder %s51_s25, %s51_s25 }
  0x1e   :  { %p2770_p3 = scmp.ne.s32.totalorder %s51_s25, %s2769_s23  ;;  %p2775_p5 = scmp.lt.s32.totalorder %s2769_s23, %s2769_s23 }
  0x20   :  { %p2776_p6 = por %p2775_p5, %p2774_p4 }
  0x22   :  { %p2777_p7 = pnand %p2776_p6, %p2770_p3 }
  0x24   :  { %2780 = shalt.err (!%p2777_p7)
}
  0x25   :  { %53 = dma.hbm_to_vmem [thread:$0]  %s3688_s29, 32, %s51_s25, [#allocation6]  }
  0x26   :  { %s3689_s3 = sld [smem:[#allocation35_spill]] }
  0x2c   :  { %s2781_s28 = scalar_lea.hbm %s3689_s3, 160 }
  0x2d   :  { %p2782_p8 = scmp.ne.s32.totalorder %s3689_s3, %s2781_s28  ;;  %p2785_p9 = scmp.lt.u32.totalorder %s2781_s28, %s3689_s3 }
  0x2f   :  { %p2787_p10 = pnand %p2785_p9, %p2782_p8 }
  0x31   :  { %2790 = shalt.err (!%p2787_p10)
}
  0x32   :  { %s2791_s22 = scalar_lea.vmem %s71_s27, 160  ;;  %p2796_p12 = scmp.lt.s32.totalorder %s71_s27, %s71_s27 }
  0x33   :  { %p2792_p11 = scmp.ne.s32.totalorder %s71_s27, %s2791_s22  ;;  %p2797_p13 = scmp.lt.s32.totalorder %s2791_s22, %s2791_s22 }
  0x35   :  { %p2798_p0 = por %p2797_p13, %p2796_p12 }
  0x37   :  { %p2799_p1 = pnand %p2798_p0, %p2792_p11 }
  0x39   :  { %2802 = shalt.err (!%p2799_p1)
}
  0x3a   :  { %73 = dma.hbm_to_vmem [thread:$0]  %s3689_s3, 160, %s71_s27, [#allocation9]  }
  0x3b   :  { %s3085_s23 = smov [#allocation11]   ;;  %s3086_s24 = smov [#allocation14]  }
  0x3c   :  { %s91_s1 = sshll.u32 %s3085_s23, 4  ;;  %s120_s2 = sshll.u32 %s3086_s24, 4  ;;  %s92_s1 = int_to_ptr.vmem [resolvable:$true] %s91_s1  ;;  %s3239_s2 = int_to_ptr.vmem [resolvable:$true] %s120_s2 }
  0x3d   :  { %s3690_s4 = sld [smem:[#allocation37_spill]] }
  0x43   :  { %s2803_s30 = scalar_lea.hbm %s3690_s4, 1024 }
  0x44   :  { %p2804_p2 = scmp.ne.s32.totalorder %s3690_s4, %s2803_s30  ;;  %p2807_p3 = scmp.lt.u32.totalorder %s2803_s30, %s3690_s4 }
  0x46   :  { %p2809_p4 = pnand %p2807_p3, %p2804_p2 }
  0x48   :  { %2812 = shalt.err (!%p2809_p4)
}
  0x49   :  { %s2813_s27 = scalar_lea.vmem %s92_s1, 1024  ;;  %p2818_p6 = scmp.lt.s32.totalorder %s92_s1, %s92_s1 }
  0x4a   :  { %p2814_p5 = scmp.ne.s32.totalorder %s92_s1, %s2813_s27  ;;  %p2819_p7 = scmp.lt.s32.totalorder %s2813_s27, %s2813_s27 }
  0x4c   :  { %p2820_p8 = por %p2819_p7, %p2818_p6 }
  0x4e   :  { %p2821_p9 = pnand %p2820_p8, %p2814_p5 }
  0x50   :  { %2824 = shalt.err (!%p2821_p9)
}
  0x51   :  { %s3087_s3 = smov 64   ;;  %s3088_s25 = smov 4  }
  0x52   :  { %97 = dma.hbm_to_vmem [thread:$0]  %s3690_s4, 1024, %s92_s1, [#allocation12], %s3087_s3, %s3087_s3, %s3088_s25  }
  0x53   :  { %s2825_s26 = scalar_lea.hbm %s3662_s10, 16 }
  0x54   :  { %p2826_p10 = scmp.ne.s32.totalorder %s3662_s10, %s2825_s26  ;;  %p2829_p11 = scmp.lt.u32.totalorder %s2825_s26, %s3662_s10 }
  0x56   :  { %p2831_p12 = pnand %p2829_p11, %p2826_p10 }
  0x58   :  { %2834 = shalt.err (!%p2831_p12)
}
  0x59   :  { %s2835_s22 = scalar_lea.vmem %s3239_s2, 16  ;;  %s2839_s1 = scalar_lea.vmem %s3239_s2, 32 }
  0x5a   :  { %p2836_p13 = scmp.ne.s32.totalorder %s3239_s2, %s2835_s22  ;;  %p2840_p0 = scmp.lt.s32.totalorder %s3239_s2, %s3239_s2 }
  0x5b   :  { %p2841_p1 = scmp.lt.s32.totalorder %s2839_s1, %s2835_s22 }
  0x5d   :  { %p2842_p2 = por %p2841_p1, %p2840_p0 }
  0x5f   :  { %p2843_p3 = pnand %p2842_p2, %p2836_p13 }
  0x61   :  { %2846 = shalt.err (!%p2843_p3)
}
  0x62   :  { %123 = dma.hbm_to_vmem [thread:$0]  %s3662_s10, 16, %s3239_s2, [#allocation15]  }
  0x63   :  { %s3089_s29 = smov [#allocation17]   ;;  %s3090_s21 = smov [#allocation20]  }
  0x64   :  { %s142_s23 = sshll.u32 %s3089_s29, 4  ;;  %s167_s24 = sshll.u32 %s3090_s21, 4  ;;  %s143_s23 = int_to_ptr.vmem [resolvable:$true] %s142_s23  ;;  %s3274_s24 = int_to_ptr.vmem [resolvable:$true] %s167_s24 }
  0x65   :  { %s2847_s30 = scalar_lea.hbm %s3664_s12, 32 }
  0x66   :  { %p2848_p4 = scmp.ne.s32.totalorder %s3664_s12, %s2847_s30  ;;  %p2851_p5 = scmp.lt.u32.totalorder %s2847_s30, %s3664_s12 }
  0x68   :  { %p2853_p6 = pnand %p2851_p5, %p2848_p4 }
  0x6a   :  { %2856 = shalt.err (!%p2853_p6)
}
  0x6b   :  { %s2857_s10 = scalar_lea.vmem %s143_s23, 32  ;;  %p2862_p8 = scmp.lt.s32.totalorder %s143_s23, %s143_s23 }
  0x6c   :  { %p2858_p7 = scmp.ne.s32.totalorder %s143_s23, %s2857_s10  ;;  %p2863_p9 = scmp.lt.s32.totalorder %s2857_s10, %s2857_s10 }
  0x6e   :  { %p2864_p10 = por %p2863_p9, %p2862_p8 }
  0x70   :  { %p2865_p11 = pnand %p2864_p10, %p2858_p7 }
  0x72   :  { %2868 = shalt.err (!%p2865_p11)
}
  0x73   :  { %145 = dma.hbm_to_vmem [thread:$0]  %s3664_s12, 32, %s143_s23, [#allocation18]  }
  0x74   :  { %s2869_s21 = scalar_lea.hbm %s3668_s16, 512 }
  0x75   :  { %p2870_p12 = scmp.ne.s32.totalorder %s3668_s16, %s2869_s21  ;;  %p2873_p13 = scmp.lt.u32.totalorder %s2869_s21, %s3668_s16 }
  0x77   :  { %p2875_p0 = pnand %p2873_p13, %p2870_p12 }
  0x79   :  { %2878 = shalt.err (!%p2875_p0)
}
  0x7a   :  { %s2879_s5 = scalar_lea.vmem %s3274_s24, 512  ;;  %p2884_p2 = scmp.lt.s32.totalorder %s3274_s24, %s3274_s24 }
  0x7b   :  { %p2880_p1 = scmp.ne.s32.totalorder %s3274_s24, %s2879_s5  ;;  %p2885_p3 = scmp.lt.s32.totalorder %s2879_s5, %s2879_s5 }
  0x7d   :  { %p2886_p4 = por %p2885_p3, %p2884_p2 }
  0x7f   :  { %p2887_p5 = pnand %p2886_p4, %p2880_p1 }
  0x81   :  { %2890 = shalt.err (!%p2887_p5)
}
  0x82   :  { %173 = dma.hbm_to_vmem [thread:$0]  %s3668_s16, 512, %s3274_s24, [#allocation21], %s3087_s3, %s3087_s3, %s3088_s25  }
  0x83   :  { %s3091_s22 = smov [#allocation2]   ;;  %s3092_s10 = smov [#allocation7]  }
  0x84   :  { %s40_s1 = sshll.u32 %s3091_s22, 4  ;;  %s60_s2 = sshll.u32 %s3092_s10, 4  ;;  %s41_s1 = int_to_ptr.vmem [resolvable:$true] %s40_s1  ;;  %s61_s2 = int_to_ptr.vmem [resolvable:$true] %s60_s2 }
  0x85   :  { %s3691_s29 = sld [smem:[#allocation32_spill]] }
  0x8b   :  { %s2891_s21 = scalar_lea.hbm %s3691_s29, 32 }
  0x8c   :  { %p2892_p6 = scmp.ne.s32.totalorder %s3691_s29, %s2891_s21  ;;  %p2895_p7 = scmp.lt.u32.totalorder %s2891_s21, %s3691_s29 }
  0x8e   :  { %p2897_p8 = pnand %p2895_p7, %p2892_p6 }
  0x90   :  { %2900 = shalt.err (!%p2897_p8)
}
  0x91   :  { %s2901_s16 = scalar_lea.vmem %s41_s1, 32  ;;  %p2906_p10 = scmp.lt.s32.totalorder %s41_s1, %s41_s1 }
  0x92   :  { %p2902_p9 = scmp.ne.s32.totalorder %s41_s1, %s2901_s16  ;;  %p2907_p11 = scmp.lt.s32.totalorder %s2901_s16, %s2901_s16 }
  0x94   :  { %p2908_p12 = por %p2907_p11, %p2906_p10 }
  0x96   :  { %p2909_p13 = pnand %p2908_p12, %p2902_p9 }
  0x98   :  { %2912 = shalt.err (!%p2909_p13)
}
  0x99   :  { %43 = dma.hbm_to_vmem [thread:$0]  %s3691_s29, 32, %s41_s1, [#allocation3]  }
  0x9a   :  { %s3692_s22 = sld [smem:[#allocation34_spill]] }
  0xa0   :  { %s2913_s10 = scalar_lea.hbm %s3692_s22, 96 }
  0xa1   :  { %p2914_p0 = scmp.ne.s32.totalorder %s3692_s22, %s2913_s10  ;;  %p2917_p1 = scmp.lt.u32.totalorder %s2913_s10, %s3692_s22 }
  0xa3   :  { %p2919_p2 = pnand %p2917_p1, %p2914_p0 }
  0xa5   :  { %2922 = shalt.err (!%p2919_p2)
}
  0xa6   :  { %s2923_s28 = scalar_lea.vmem %s61_s2, 96  ;;  %p2928_p4 = scmp.lt.s32.totalorder %s61_s2, %s61_s2 }
  0xa7   :  { %p2924_p3 = scmp.ne.s32.totalorder %s61_s2, %s2923_s28  ;;  %p2929_p5 = scmp.lt.s32.totalorder %s2923_s28, %s2923_s28 }
  0xa9   :  { %p2930_p6 = por %p2929_p5, %p2928_p4 }
  0xab   :  { %p2931_p7 = pnand %p2930_p6, %p2924_p3 }
  0xad   :  { %2934 = shalt.err (!%p2931_p7)
}
  0xae   :  { %63 = dma.hbm_to_vmem [thread:$0]  %s3692_s22, 96, %s61_s2, [#allocation6]  }
  0xaf   :  { %s3093_s30 = smov [#allocation10]   ;;  %s3094_s16 = smov [#allocation13]  }
  0xb0   :  { %s79_s0 = sshll.u32 %s3093_s30, 4  ;;  %s108_s24 = sshll.u32 %s3094_s16, 4  ;;  %s80_s0 = int_to_ptr.vmem [resolvable:$true] %s79_s0  ;;  %s109_s24 = int_to_ptr.vmem [resolvable:$true] %s108_s24 }
  0xb1   :  { %s3693_s23 = sld [smem:[#allocation36_spill]] }
  0xb7   :  { %s2935_s10 = scalar_lea.hbm %s3693_s23, 1024 }
  0xb8   :  { %p2936_p8 = scmp.ne.s32.totalorder %s3693_s23, %s2935_s10  ;;  %p2939_p9 = scmp.lt.u32.totalorder %s2935_s10, %s3693_s23 }
  0xba   :  { %p2941_p10 = pnand %p2939_p9, %p2936_p8 }
  0xbc   :  { %2944 = shalt.err (!%p2941_p10)
}
  0xbd   :  { %s2945_s2 = scalar_lea.vmem %s80_s0, 1024  ;;  %p2950_p12 = scmp.lt.s32.totalorder %s80_s0, %s80_s0 }
  0xbe   :  { %p2946_p11 = scmp.ne.s32.totalorder %s80_s0, %s2945_s2  ;;  %p2951_p13 = scmp.lt.s32.totalorder %s2945_s2, %s2945_s2 }
  0xc0   :  { %p2952_p0 = por %p2951_p13, %p2950_p12 }
  0xc2   :  { %p2953_p1 = pnand %p2952_p0, %p2946_p11 }
  0xc4   :  { %2956 = shalt.err (!%p2953_p1)
}
  0xc5   :  { %85 = dma.hbm_to_vmem [thread:$0]  %s3693_s23, 1024, %s80_s0, [#allocation9], %s3087_s3, %s3087_s3, %s3088_s25  }
  0xc6   :  { %s2957_s30 = scalar_lea.hbm %s3660_s8, 16 }
  0xc7   :  { %p2958_p2 = scmp.ne.s32.totalorder %s3660_s8, %s2957_s30  ;;  %p2961_p3 = scmp.lt.u32.totalorder %s2957_s30, %s3660_s8 }
  0xc9   :  { %p2963_p4 = pnand %p2961_p3, %p2958_p2 }
  0xcb   :  { %2966 = shalt.err (!%p2963_p4)
}
  0xcc   :  { %s2967_s4 = scalar_lea.vmem %s109_s24, 16  ;;  %s2971_s27 = scalar_lea.vmem %s109_s24, 32 }
  0xcd   :  { %p2968_p5 = scmp.ne.s32.totalorder %s109_s24, %s2967_s4  ;;  %p2972_p6 = scmp.lt.s32.totalorder %s109_s24, %s109_s24 }
  0xce   :  { %p2973_p7 = scmp.lt.s32.totalorder %s2971_s27, %s2967_s4 }
  0xd0   :  { %p2974_p8 = por %p2973_p7, %p2972_p6 }
  0xd2   :  { %p2975_p9 = pnand %p2974_p8, %p2968_p5 }
  0xd4   :  { %2978 = shalt.err (!%p2975_p9)
}
  0xd5   :  { %111 = dma.hbm_to_vmem [thread:$0]  %s3660_s8, 16, %s109_s24, [#allocation12]  }
  0xd6   :  { %s3095_s21 = smov [#allocation16]   ;;  %s2979_s28 = scalar_lea.hbm %s3663_s11, 10112 }
  0xd7   :  { %s129_s26 = sshll.u32 %s3095_s21, 4  ;;  %p2980_p10 = scmp.ne.s32.totalorder %s3663_s11, %s2979_s28  ;;  %s130_s26 = int_to_ptr.vmem [resolvable:$true] %s129_s26 }
  0xd8   :  { %p2983_p11 = scmp.lt.u32.totalorder %s2979_s28, %s3663_s11 }
  0xda   :  { %p2985_p12 = pnand %p2983_p11, %p2980_p10 }
  0xdc   :  { %2988 = shalt.err (!%p2985_p12)
}
  0xdd   :  { %s2989_s5 = scalar_lea.vmem %s130_s26, 10112  ;;  %p2994_p0 = scmp.lt.s32.totalorder %s130_s26, %s130_s26 }
  0xde   :  { %p2990_p13 = scmp.ne.s32.totalorder %s130_s26, %s2989_s5  ;;  %p2995_p1 = scmp.lt.s32.totalorder %s2989_s5, %s2989_s5 }
  0xe0   :  { %p2996_p2 = por %p2995_p1, %p2994_p0 }
  0xe2   :  { %p2997_p3 = pnand %p2996_p2, %p2990_p13 }
  0xe4   :  { %3000 = shalt.err (!%p2997_p3)
}
  0xe5   :  { %s3096_s8 = smov 128   ;;  %s3097_s24 = smov 8  }
  0xe6   :  { %135 = dma.hbm_to_vmem [thread:$0]  %s3663_s11, 10112, %s130_s26, [#allocation15], %s3096_s8, %s3096_s8, %s3097_s24  }
  0xe7   :  { %s3098_s4 = smov [#allocation19]   ;;  %s3099_s0 = smov [#allocation22]  }
  0xe8   :  { %s151_s27 = sshll.u32 %s3098_s4, 4  ;;  %s179_s23 = sshll.u32 %s3099_s0, 4  ;;  %s152_s27 = int_to_ptr.vmem [resolvable:$true] %s151_s27  ;;  %s180_s23 = int_to_ptr.vmem [resolvable:$true] %s179_s23 }
  0xe9   :  { %s3001_s22 = scalar_lea.hbm %s3665_s13, 2048 }
  0xea   :  { %p3002_p4 = scmp.ne.s32.totalorder %s3665_s13, %s3001_s22  ;;  %p3005_p5 = scmp.lt.u32.totalorder %s3001_s22, %s3665_s13 }
  0xec   :  { %p3007_p6 = pnand %p3005_p5, %p3002_p4 }
  0xee   :  { %3010 = shalt.err (!%p3007_p6)
}
  0xef   :  { %s3011_s11 = scalar_lea.vmem %s152_s27, 2048  ;;  %p3016_p8 = scmp.lt.s32.totalorder %s152_s27, %s152_s27 }
  0xf0   :  { %p3012_p7 = scmp.ne.s32.totalorder %s152_s27, %s3011_s11  ;;  %p3017_p9 = scmp.lt.s32.totalorder %s3011_s11, %s3011_s11 }
  0xf2   :  { %p3018_p10 = por %p3017_p9, %p3016_p8 }
  0xf4   :  { %p3019_p11 = pnand %p3018_p10, %p3012_p7 }
  0xf6   :  { %3022 = shalt.err (!%p3019_p11)
}
  0xf7   :  { %157 = dma.hbm_to_vmem [thread:$0]  %s3665_s13, 2048, %s152_s27, [#allocation18], %s3087_s3, %s3087_s3, %s3088_s25  }
  0xf8   :  { %s3023_s24 = scalar_lea.hbm %s3669_s17, 1024 }
  0xf9   :  { %p3024_p12 = scmp.ne.s32.totalorder %s3669_s17, %s3023_s24  ;;  %p3027_p13 = scmp.lt.u32.totalorder %s3023_s24, %s3669_s17 }
  0xfb   :  { %p3029_p0 = pnand %p3027_p13, %p3024_p12 }
  0xfd   :  { %3032 = shalt.err (!%p3029_p0)
}
  0xfe   :  { %s3033_s21 = scalar_lea.vmem %s180_s23, 1024  ;;  %p3038_p2 = scmp.lt.s32.totalorder %s180_s23, %s180_s23 }
  0xff   :  { %p3034_p1 = scmp.ne.s32.totalorder %s180_s23, %s3033_s21  ;;  %p3039_p3 = scmp.lt.s32.totalorder %s3033_s21, %s3033_s21 }
 0x101   :  { %p3040_p4 = por %p3039_p3, %p3038_p2 }
 0x103   :  { %p3041_p5 = pnand %p3040_p4, %p3034_p1 }
 0x105   :  { %3044 = shalt.err (!%p3041_p5)
}
 0x106   :  { %185 = dma.hbm_to_vmem [thread:$0]  %s3669_s17, 1024, %s180_s23, [#allocation21], %s3087_s3, %s3087_s3, %s3088_s25  }
 0x107   :  { %3067 = dma.done.wait [#allocation3], 32  }
 0x108   :  { %3068 = vsyncadd [#allocation3], 4294967264 }
 0x109   :  { %3069 = dma.done.wait [#allocation6], 128  }
 0x10a   :  { %3070 = vsyncadd [#allocation6], 4294967168 }
 0x10b   :  { %3071 = dma.done.wait [#allocation9], 1184  }
 0x10c   :  { %3072 = vsyncadd [#allocation9], 4294966112 }
 0x10d   :  { %3073 = dma.done.wait [#allocation12], 1040  }
 0x10e   :  { %3074 = vsyncadd [#allocation12], 4294966256 }
 0x10f   :  { %3075 = dma.done.wait [#allocation15], 10128  }
 0x110   :  { %3076 = vsyncadd [#allocation15], 4294957168 }
 0x111   :  { %3077 = dma.done.wait [#allocation18], 2080  }
 0x112   :  { %3078 = vsyncadd [#allocation18], 4294965216 }
 0x113   :  { %3079 = dma.done.wait [#allocation21], 1536  }
 0x114   :  { %3080 = vsyncadd [#allocation21], 4294965760  ;;  %v3100_v0 = vmov 0.0   ;;  %vm3101_vm0 = vmmov 0   ;;  %v2552_v1 = vld [vmem:[#allocation11] sm:$0xff]   ;;  %v2554_v3 = vld [vmem:[#allocation11 + $0x8] sm:$0xff]   ;;  %v460_v16 = vlaneseq }
 0x115   :  { %2380 = vmatprep.subr.bf16.mxu0 %v3100_v0  ;;  %2400 = vmatprep.subr.bf16.mxu1 %v3100_v0  ;;  %v2553_v2 = vld [vmem:[#allocation10] sm:$0xff]   ;;  %v2555_v4 = vld [vmem:[#allocation10 + $0x8] sm:$0xff]   ;;  %v2556_v5 = vld [vmem:[#allocation11 + $0x10] sm:$0xff]   ;;  %v3102_v14 = vmov 1983009808   ;;  %vm629_vm1 = vcmask 261120  }
 0x116   :  { %2396 = vmatprep.mubr.msk.bf16.mxu0 %vm3101_vm0, %v3100_v0  ;;  %2416 = vmatprep.mubr.msk.bf16.mxu1 %vm3101_vm0, %v3100_v0  ;;  %v2557_v6 = vld [vmem:[#allocation10 + $0x10] sm:$0xff]   ;;  %v2558_v7 = vld [vmem:[#allocation11 + $0x18] sm:$0xff]   ;;  %v2560_v9 = vld [vmem:[#allocation11 + $0x20] sm:$0xff]   ;;  %v458_v15 = vunpack.c.l.s4 %v3102_v14  ;;  %v3422_v23 = vshrl.u32 %v460_v16, 7  ;;  %vm1356_vm2 = vcmask 1040384   ;;  %vm1352_vm3 = vcmask 924672  }
 0x117   :  { %2381 = vmatpush3.bf16.msra.mxu0 %v2552_v1  ;;  %2401 = vmatpush3.bf16.msra.mxu1 %v2553_v2  ;;  %v2559_v8 = vld [vmem:[#allocation10 + $0x18] sm:$0xff]   ;;  %v2561_v10 = vld [vmem:[#allocation10 + $0x20] sm:$0xff]   ;;  %v2562_v11 = vld [vmem:[#allocation11 + $0x28] sm:$0xff]   ;;  %vm1717_vm4 = vcmask 523264   ;;  %s3104_s24 = smov [#allocation23]   ;;  %vm2075_vm5 = vcmask 58368  }
 0x118   :  { %2382 = vmatprep.subr.bf16.mxu0 %v3100_v0  ;;  %2402 = vmatprep.subr.bf16.mxu1 %v3100_v0  ;;  %v2563_v12 = vld [vmem:[#allocation10 + $0x28] sm:$0xff]   ;;  %v2564_v13 = vld [vmem:[#allocation11 + $0x30] sm:$0xff]   ;;  %v2566_v18 = vld [vmem:[#allocation11 + $0x38] sm:$0xff]   ;;  %v459_v22 = vunpack.c.0.s8 %v458_v15 }
 0x119   :  { %v2565_v17 = vld [vmem:[#allocation10 + $0x30] sm:$0xff]   ;;  %v2567_v19 = vld [vmem:[#allocation10 + $0x38] sm:$0xff]   ;;  %v250_v20 = vld [vmem:[#allocation5] sm:$0x3] }
 0x11a   :  { %v2568_v21 = vld [vmem:[%s3659_s7 + $0x40] sm:$0xff]   ;;  %v251_v25 = vpack.c.bf16 %v250_v20, %v250_v20  ;;  %v3430_v28 = vsub.s32 %v459_v22, %v3422_v23  ;;  %v2570_v29 = vld [vmem:[%s3659_s7 + $0x48] sm:$0xff]   ;;  %v2572_v35 = vld [vmem:[%s3659_s7 + $0x50] sm:$0xff]  }
 0x11b   :  { %2383 = vmatpush3.bf16.msra.mxu0 %v2554_v3  ;;  %2403 = vmatpush3.bf16.msra.mxu1 %v2555_v4  ;;  %v232_v24 = vld [vmem:[#allocation2] sm:$0x3]  ;;  %v454_v31 = vld [vmem:[#allocation7] sm:$0x3f]  ;;  %v2573_v39 = vld [vmem:[%s3659_s7 + $0x10] sm:$0xff]  }
 0x11c   :  { %2384 = vmatprep.subr.bf16.mxu0 %v3100_v0  ;;  %2404 = vmatprep.subr.bf16.mxu1 %v3100_v0  ;;  %v233_v26 = vpack.c.bf16 %v232_v24, %v232_v24  ;;  %v2569_v27 = vld [vmem:[%s3659_s7] sm:$0xff]   ;;  %v2571_v32 = vld [vmem:[%s3659_s7 + $0x8] sm:$0xff]   ;;  %v456_v33 = vcombine.high %v454_v31, %v454_v31  ;;  %v463_v34 = vrot.slane %v454_v31, %v3430_v28  ;;  %v2574_v42 = vld [vmem:[%s3659_s7 + $0x58] sm:$0xff]  }
 0x11d   :  { %v2584_v30 = vld [vmem:[%s3659_s7 + $0x80] sm:$0xff]   ;;  %v2589_v38 = vld [vmem:[%s3659_s7 + $0x88] sm:$0xff]   ;;  %v2575_v43 = vld [vmem:[%s3659_s7 + $0x18] sm:$0xff]  }
 0x11e   :  { %v470_v36 = vrot.slane %v456_v33, %v3430_v28  ;;  %v471_v37 = vcombine.high %v463_v34, %v463_v34  ;;  %v2576_v44 = vld [vmem:[%s3659_s7 + $0x60] sm:$0xff]   ;;  %v2578_v46 = vld [vmem:[%s3659_s7 + $0x68] sm:$0xff]   ;;  %v2580_v48 = vld [vmem:[%s3659_s7 + $0x70] sm:$0xff]   ;;  %v475_v56 = vpack.c.bf16 %v463_v34, %v463_v34 }
 0x11f   :  { %2385 = vmatpush3.bf16.msra.mxu0 %v2556_v5  ;;  %2405 = vmatpush3.bf16.msra.mxu1 %v2557_v6  ;;  %v2577_v45 = vld [vmem:[%s3659_s7 + $0x20] sm:$0xff]   ;;  %v2579_v47 = vld [vmem:[%s3659_s7 + $0x28] sm:$0xff]   ;;  %v2581_v49 = vld [vmem:[%s3659_s7 + $0x30] sm:$0xff]  }
 0x120   :  { %2386 = vmatprep.subr.bf16.mxu0 %v3100_v0  ;;  %2406 = vmatprep.subr.bf16.mxu1 %v3100_v0  ;;  %v476_v40 = vpack.c.bf16 %v471_v37, %v471_v37  ;;  %v477_v41 = vpack.c.bf16 %v470_v36, %v470_v36  ;;  %v2582_v50 = vld [vmem:[%s3659_s7 + $0x78] sm:$0xff]   ;;  %v3486_v51 = vld [vmem:[#allocation8] sm:$0xff] }
 0x121   :  { %v3490_v52 = vrot.slane %v3486_v51, %v3430_v28  ;;  %v2583_v53 = vld [vmem:[%s3659_s7 + $0x38] sm:$0xff]   ;;  %v2592_v59 = vld [vmem:[#allocation16 + $0x14] ss:$8 sps:$4 sm:$0xff]   ;;  %v2590_v60 = vld [vmem:[#allocation16 + $0x10] ss:$8 sps:$4 sm:$0xff]   ;;  %v832_v24 = vcombine.high %v3486_v51, %v3486_v51 }
 0x122   :  { %v2588_v54 = vld [vmem:[#allocation16 + $0x4] ss:$8 sps:$4 sm:$0xff]   ;;  %v2586_v57 = vld [vmem:[#allocation16] ss:$8 sps:$4 sm:$0xff]   ;;  %v2598_v63 = vld [vmem:[#allocation16 + $0x34] ss:$8 sps:$4 sm:$0xff]  }
 0x123   :  { %2387 = vmatpush3.bf16.msra.mxu0 %v2558_v7  ;;  %2407 = vmatpush3.bf16.msra.mxu1 %v2559_v8  ;;  %v847_v55 = vcombine.high %v3490_v52, %v3490_v52  ;;  %v2595_v61 = vld [vmem:[#allocation16 + $0x24] ss:$8 sps:$4 sm:$0xff]   ;;  %v2593_v62 = vld [vmem:[#allocation16 + $0x20] ss:$8 sps:$4 sm:$0xff]   ;;  %v2596_v1 = vld [vmem:[#allocation16 + $0x30] ss:$8 sps:$4 sm:$0xff]   ;;  %v861_v33 = vpack.c.bf16 %v3490_v52, %v3490_v52 }
 0x124   :  { %2388 = vmatprep.subr.bf16.mxu0 %v3100_v0  ;;  %2408 = vmatprep.subr.bf16.mxu1 %v3100_v0  ;;  %v2601_v2 = vld [vmem:[#allocation16 + $0x44] ss:$8 sps:$4 sm:$0xff]   ;;  %v2599_v3 = vld [vmem:[#allocation16 + $0x40] ss:$8 sps:$4 sm:$0xff]   ;;  %v2604_v4 = vld [vmem:[#allocation16 + $0x54] ss:$8 sps:$4 sm:$0xff]  }
 0x125   :  { %v862_v58 = vpack.c.bf16 %v847_v55, %v847_v55  ;;  %v2602_v5 = vld [vmem:[#allocation16 + $0x50] ss:$8 sps:$4 sm:$0xff]   ;;  %v2607_v6 = vld [vmem:[#allocation16 + $0x64] ss:$8 sps:$4 sm:$0xff]   ;;  %v2605_v7 = vld [vmem:[#allocation16 + $0x60] ss:$8 sps:$4 sm:$0xff]  }
 0x126   :  { %v2610_v8 = vld [vmem:[#allocation16 + $0x74] ss:$8 sps:$4 sm:$0xff]   ;;  %v2619_v14 = vld [vmem:[#allocation16 + $0xa4] ss:$8 sps:$4 sm:$0xff]   ;;  %v2617_v15 = vld [vmem:[#allocation16 + $0xa0] ss:$8 sps:$4 sm:$0xff]  }
 0x127   :  { %2389 = vmatpush3.bf16.msra.mxu0 %v2560_v9  ;;  %2409 = vmatpush3.bf16.msra.mxu1 %v2561_v10  ;;  %v2608_v9 = vld [vmem:[#allocation16 + $0x70] ss:$8 sps:$4 sm:$0xff]   ;;  %v2613_v10 = vld [vmem:[#allocation16 + $0x84] ss:$8 sps:$4 sm:$0xff]   ;;  %v2622_v16 = vld [vmem:[#allocation16 + $0xb4] ss:$8 sps:$4 sm:$0xff]  }
 0x128   :  { %2390 = vmatprep.subr.bf16.mxu0 %v3100_v0  ;;  %2410 = vmatprep.subr.bf16.mxu1 %v3100_v0  ;;  %v2628_v20 = vld [vmem:[#allocation16 + $0xd4] ss:$8 sps:$4 sm:$0xff]   ;;  %v2631_v22 = vld [vmem:[#allocation16 + $0xe4] ss:$8 sps:$4 sm:$0xff]   ;;  %v2635_v34 = vld [vmem:[#allocation16 + $0x100] ss:$8 sps:$4 sm:$0xff]  }
 0x129   :  { %v2708_v36 = vld [vmem:[%s3661_s9 + $0x8] sm:$0xff]   ;;  %v2653_v51 = vld [vmem:[#allocation16 + $0x160] ss:$8 sps:$4 sm:$0xff]   ;;  %v2661_v55 = vld [vmem:[#allocation16 + $0x184] ss:$8 sps:$4 sm:$0xff]  }
 0x12a   :  { %v2638_v37 = vld [vmem:[#allocation16 + $0x110] ss:$8 sps:$4 sm:$0xff]   ;;  %v2658_v52 = vld [vmem:[#allocation16 + $0x174] ss:$8 sps:$4 sm:$0xff]  }
 0x12b   :  { %2391 = vmatpush3.bf16.msra.mxu0 %v2562_v11  ;;  %2411 = vmatpush3.bf16.msra.mxu1 %v2563_v12  ;;  %v2611_v11 = vld [vmem:[#allocation16 + $0x80] ss:$8 sps:$4 sm:$0xff]   ;;  %v2616_v12 = vld [vmem:[#allocation16 + $0x94] ss:$8 sps:$4 sm:$0xff]  }
 0x12c   :  { %2392 = vmatprep.subr.bf16.mxu0 %v3100_v0  ;;  %2412 = vmatprep.subr.bf16.mxu1 %v3100_v0 }
 0x12f   :  { %2393 = vmatpush3.bf16.msra.mxu0 %v2564_v13  ;;  %2413 = vmatpush3.bf16.msra.mxu1 %v2565_v17  ;;  %v2614_v13 = vld [vmem:[#allocation16 + $0x90] ss:$8 sps:$4 sm:$0xff]  }
 0x130   :  { %2394 = vmatprep.subr.bf16.mxu0 %v3100_v0  ;;  %2414 = vmatprep.subr.bf16.mxu1 %v3100_v0  ;;  %v2620_v17 = vld [vmem:[#allocation16 + $0xb0] ss:$8 sps:$4 sm:$0xff]  }
 0x133   :  { %2395 = vmatpush3.bf16.msra.mxu0 %v2566_v18  ;;  %2415 = vmatpush3.bf16.msra.mxu1 %v2567_v19  ;;  %v2625_v18 = vld [vmem:[#allocation16 + $0xc4] ss:$8 sps:$4 sm:$0xff]   ;;  %v2623_v19 = vld [vmem:[#allocation16 + $0xc0] ss:$8 sps:$4 sm:$0xff]  }
 0x134   :  { %2292 = vmatprep.subr.bf16.mxu0 %v2568_v21  ;;  %2420 = vmatprep.subr.bf16.mxu1 %v3100_v0  ;;  %v2626_v21 = vld [vmem:[#allocation16 + $0xd0] ss:$8 sps:$4 sm:$0xff]  }
 0x136   :  { %2397 = vmatmul.mubr.bf16.vlgmr.msra.gmra.mrb[0].mxu0 %v251_v25  ;;  %2417 = vmatmul.mubr.bf16.vlgmr.msra.gmra.mrb[0].mxu1 %v233_v26  ;;  %v2629_v25 = vld [vmem:[#allocation16 + $0xe0] ss:$8 sps:$4 sm:$0xff]   ;;  %v2634_v26 = vld [vmem:[#allocation16 + $0xf4] ss:$8 sps:$4 sm:$0xff]  }
 0x137   :  { %2293 = vmatpush3.bf16.msra.mxu0 %v2569_v27  ;;  %2421 = vmatpush3.bf16.msra.mxu1 %v2584_v30  ;;  %v3500_v27 = vrot.slane %v832_v24, %v3430_v28  ;;  %v2637_v30 = vld [vmem:[#allocation16 + $0x104] ss:$8 sps:$4 sm:$0xff]   ;;  %v2640_v28 = vld [vmem:[#allocation16 + $0x114] ss:$8 sps:$4 sm:$0xff]  }
 0x138   :  { %2294 = vmatprep.subr.bf16.mxu0 %v2570_v29  ;;  %2422 = vmatprep.subr.bf16.mxu1 %v3100_v0  ;;  %v2632_v29 = vld [vmem:[#allocation16 + $0xf0] ss:$8 sps:$4 sm:$0xff]  }
 0x139   :  { %2424 = vmatprep.mubr.msk.bf16.mxu1 %vm3101_vm0, %v3100_v0  ;;  %665 = vmatprep.mubr.bf16.mxu0 %v476_v40  ;;  %v848_v31 = vcombine.high %v3500_v27, %v3500_v27  ;;  %v2641_v40 = vld [vmem:[#allocation16 + $0x120] ss:$8 sps:$4 sm:$0xff]   ;;  %v944_v24 = vld [vmem:[#allocation16 + $0x270] sm:$0x11] }
 0x13b   :  { %2295 = vmatpush3.bf16.msra.mxu0 %v2571_v32  ;;  %2423 = vmatpush3.bf16.msra.mxu1 %v2589_v38  ;;  %v2707_v32 = vld [vmem:[%s3661_s9] sm:$0xff]  }
 0x13c   :  { %2296 = vmatprep.subr.bf16.mxu0 %v2572_v35  ;;  %2428 = vmatprep.subr.bf16.mxu1 %v3100_v0  ;;  %v864_v35 = vpack.c.bf16 %v848_v31, %v848_v31  ;;  %v2643_v38 = vld [vmem:[#allocation16 + $0x124] ss:$8 sps:$4 sm:$0xff]   ;;  %v2223_v31 = vcombine.low %v944_v24, %v944_v24 }
 0x13e   :  { %2425 = vmatmul.mubr.msk.bf16.vlgmr.msra.gmra.mrb[4].mxu1 %vm629_vm1, %v477_v41  ;;  %v2646_v41 = vld [vmem:[#allocation16 + $0x134] ss:$8 sps:$4 sm:$0xff]  }
 0x13f   :  { %2297 = vmatpush3.bf16.msra.mxu0 %v2573_v39  ;;  %2444 = vmatprep.mubr.msk.bf16.mxu1 %vm3101_vm0, %v3100_v0  ;;  %v2709_v39 = vld [vmem:[%s3661_s9 + $0x10] sm:$0xff]  }
 0x140   :  { %2298 = vmatprep.subr.bf16.mxu0 %v2574_v42  ;;  %2429 = vmatpush3.bf16.msra.mxu1 %v2707_v32  ;;  %v2710_v42 = vld [vmem:[%s3661_s9 + $0x18] sm:$0xff]  }
 0x141   :  { %2430 = vmatprep.subr.bf16.mxu1 %v3100_v0 }
 0x143   :  { %2299 = vmatpush3.bf16.msra.mxu0 %v2575_v43  ;;  %v2644_v43 = vld [vmem:[#allocation16 + $0x130] ss:$8 sps:$4 sm:$0xff]  }
 0x144   :  { %2300 = vmatprep.subr.bf16.mxu0 %v2576_v44  ;;  %2431 = vmatpush3.bf16.msra.mxu1 %v2708_v36  ;;  %v2649_v44 = vld [vmem:[#allocation16 + $0x144] ss:$8 sps:$4 sm:$0xff]  }
 0x145   :  { %2432 = vmatprep.subr.bf16.mxu1 %v3100_v0 }
 0x147   :  { %2301 = vmatpush3.bf16.msra.mxu0 %v2577_v45  ;;  %v2711_v45 = vld [vmem:[%s3661_s9 + $0x20] sm:$0xff]  }
 0x148   :  { %2302 = vmatprep.subr.bf16.mxu0 %v2578_v46  ;;  %2433 = vmatpush3.bf16.msra.mxu1 %v2709_v39  ;;  %v2647_v46 = vld [vmem:[#allocation16 + $0x140] ss:$8 sps:$4 sm:$0xff]  }
 0x149   :  { %2434 = vmatprep.subr.bf16.mxu1 %v3100_v0 }
 0x14b   :  { %2303 = vmatpush3.bf16.msra.mxu0 %v2579_v47  ;;  %v2652_v47 = vld [vmem:[#allocation16 + $0x154] ss:$8 sps:$4 sm:$0xff]  }
 0x14c   :  { %2304 = vmatprep.subr.bf16.mxu0 %v2580_v48  ;;  %2435 = vmatpush3.bf16.msra.mxu1 %v2710_v42  ;;  %v2650_v48 = vld [vmem:[#allocation16 + $0x150] ss:$8 sps:$4 sm:$0xff]  }
 0x14d   :  { %2436 = vmatprep.subr.bf16.mxu1 %v3100_v0 }
 0x14f   :  { %2305 = vmatpush3.bf16.msra.mxu0 %v2581_v49  ;;  %v2655_v49 = vld [vmem:[#allocation16 + $0x164] ss:$8 sps:$4 sm:$0xff]  }
 0x150   :  { %2306 = vmatprep.subr.bf16.mxu0 %v2582_v50  ;;  %2437 = vmatpush3.bf16.msra.mxu1 %v2711_v45  ;;  %v2712_v50 = vld [vmem:[%s3661_s9 + $0x28] sm:$0xff]  }
 0x151   :  { %2438 = vmatprep.subr.bf16.mxu1 %v3100_v0 }
 0x153   :  { %2307 = vmatpush3.bf16.msra.mxu0 %v2583_v53  ;;  %v2713_v53 = vld [vmem:[%s3661_s9 + $0x30] sm:$0xff]  }
 0x154   :  { %1365 = vmatprep.subr.bf16.mxu0 %v2588_v54  ;;  %2439 = vmatpush3.bf16.msra.mxu1 %v2712_v50  ;;  %v2656_v54 = vld [vmem:[#allocation16 + $0x170] ss:$8 sps:$4 sm:$0xff]   ;;  %v2115_v50 = vld [vmem:[#allocation13] ss:$0 sm:$0xff] }
 0x155   :  { %2440 = vmatprep.subr.bf16.mxu1 %v3100_v0 }
 0x156   :  { %666 = vmatmul.mubr.bf16.vlgmr.msra.gmra.mrb[4].mxu0 %v475_v56  ;;  %v2714_v56 = vld [vmem:[%s3661_s9 + $0x38] sm:$0xff]  }
 0x157   :  { %1366 = vmatpush1.bf16.msra.mxu0 %v2586_v57  ;;  %1397 = vmatprep.mubr.bf16.mxu0 %v862_v58  ;;  %v2659_v57 = vld [vmem:[#allocation16 + $0x180] ss:$8 sps:$4 sm:$0xff]   ;;  %v2664_v58 = vld [vmem:[#allocation16 + $0x194] ss:$8 sps:$4 sm:$0xff]  }
 0x158   :  { %1367 = vmatprep.subr.bf16.mxu0 %v2592_v59  ;;  %2441 = vmatpush3.bf16.msra.mxu1 %v2713_v53  ;;  %v2715_v59 = vld [vmem:[#allocation19 + $0x40] sm:$0xff]  }
 0x159   :  { %2442 = vmatprep.subr.bf16.mxu1 %v3100_v0 }
 0x15b   :  { %1368 = vmatpush1.bf16.msra.mxu0 %v2590_v60  ;;  %v2662_v60 = vld [vmem:[#allocation16 + $0x190] ss:$8 sps:$4 sm:$0xff]  }
 0x15c   :  { %1369 = vmatprep.subr.bf16.mxu0 %v2595_v61  ;;  %2443 = vmatpush3.bf16.msra.mxu1 %v2714_v56  ;;  %v2667_v61 = vld [vmem:[#allocation16 + $0x1a4] ss:$8 sps:$4 sm:$0xff]  }
 0x15d   :  { %2326 = vmatprep.subr.bf16.mxu1 %v2715_v59  ;;  %v2717_v59 = vld [vmem:[#allocation19 + $0x48] sm:$0xff]  }
 0x15f   :  { %1370 = vmatpush1.bf16.msra.mxu0 %v2593_v62  ;;  %v2665_v62 = vld [vmem:[#allocation16 + $0x1a0] ss:$8 sps:$4 sm:$0xff]  }
 0x160   :  { %1371 = vmatprep.subr.bf16.mxu0 %v2598_v63  ;;  %v2670_v63 = vld [vmem:[#allocation16 + $0x1b4] ss:$8 sps:$4 sm:$0xff]  }
 0x163   :  { %1372 = vmatpush1.bf16.msra.mxu0 %v2596_v1  ;;  %v2668_v1 = vld [vmem:[#allocation16 + $0x1b0] ss:$8 sps:$4 sm:$0xff]  }
 0x164   :  { %1373 = vmatprep.subr.bf16.mxu0 %v2601_v2  ;;  %v2673_v2 = vld [vmem:[#allocation16 + $0x1c4] ss:$8 sps:$4 sm:$0xff]  }
 0x167   :  { %1374 = vmatpush1.bf16.msra.mxu0 %v2599_v3  ;;  %v2671_v3 = vld [vmem:[#allocation16 + $0x1c0] ss:$8 sps:$4 sm:$0xff]  }
 0x168   :  { %1375 = vmatprep.subr.bf16.mxu0 %v2604_v4  ;;  %v2676_v4 = vld [vmem:[#allocation16 + $0x1d4] ss:$8 sps:$4 sm:$0xff]  }
 0x16b   :  { %1376 = vmatpush1.bf16.msra.mxu0 %v2602_v5  ;;  %v2674_v5 = vld [vmem:[#allocation16 + $0x1d0] ss:$8 sps:$4 sm:$0xff]  }
 0x16c   :  { %1377 = vmatprep.subr.bf16.mxu0 %v2607_v6  ;;  %v2679_v6 = vld [vmem:[#allocation16 + $0x1e4] ss:$8 sps:$4 sm:$0xff]  }
 0x16f   :  { %1378 = vmatpush1.bf16.msra.mxu0 %v2605_v7  ;;  %v2677_v7 = vld [vmem:[#allocation16 + $0x1e0] ss:$8 sps:$4 sm:$0xff]  }
 0x170   :  { %1379 = vmatprep.subr.bf16.mxu0 %v2610_v8  ;;  %v2682_v8 = vld [vmem:[#allocation16 + $0x1f4] ss:$8 sps:$4 sm:$0xff]  }
 0x173   :  { %1380 = vmatpush1.bf16.msra.mxu0 %v2608_v9  ;;  %v2680_v9 = vld [vmem:[#allocation16 + $0x1f0] ss:$8 sps:$4 sm:$0xff]  }
 0x174   :  { %1381 = vmatprep.subr.bf16.mxu0 %v2613_v10  ;;  %v2686_v10 = vld [vmem:[#allocation16 + $0x204] ss:$8 sps:$4 sm:$0xff]  }
 0x177   :  { %1382 = vmatpush1.bf16.msra.mxu0 %v2611_v11  ;;  %v863_v11 = vpack.c.bf16 %v3500_v27, %v3500_v27  ;;  %v2224_v27 = vcombine.high %v944_v24, %v944_v24 }
 0x178   :  { %1383 = vmatprep.subr.bf16.mxu0 %v2616_v12  ;;  %v2684_v12 = vld [vmem:[#allocation16 + $0x200] ss:$8 sps:$4 sm:$0xff]  }
 0x17b   :  { %1384 = vmatpush1.bf16.msra.mxu0 %v2614_v13  ;;  %v2689_v13 = vld [vmem:[#allocation16 + $0x214] ss:$8 sps:$4 sm:$0xff]  }
 0x17c   :  { %1385 = vmatprep.subr.bf16.mxu0 %v2619_v14  ;;  %v2687_v14 = vld [vmem:[#allocation16 + $0x210] ss:$8 sps:$4 sm:$0xff]  }
 0x17f   :  { %1386 = vmatpush1.bf16.msra.mxu0 %v2617_v15  ;;  %v3103_v15 = vmov 0  }
 0x180   :  { %1387 = vmatprep.subr.bf16.mxu0 %v2622_v16  ;;  %v2692_v16 = vld [vmem:[#allocation16 + $0x224] ss:$8 sps:$4 sm:$0xff]  }
 0x183   :  { %1388 = vmatpush1.bf16.msra.mxu0 %v2620_v17  ;;  %v2690_v17 = vld [vmem:[#allocation16 + $0x220] ss:$8 sps:$4 sm:$0xff]  }
 0x184   :  { %1389 = vmatprep.subr.bf16.mxu0 %v2625_v18  ;;  %v2695_v18 = vld [vmem:[#allocation16 + $0x234] ss:$8 sps:$4 sm:$0xff]  }
 0x187   :  { %1390 = vmatpush1.bf16.msra.mxu0 %v2623_v19  ;;  %v2693_v19 = vld [vmem:[#allocation16 + $0x230] ss:$8 sps:$4 sm:$0xff]  }
 0x188   :  { %1391 = vmatprep.subr.bf16.mxu0 %v2628_v20  ;;  %v2698_v20 = vld [vmem:[#allocation16 + $0x244] ss:$8 sps:$4 sm:$0xff]  }
 0x18b   :  { %1392 = vmatpush1.bf16.msra.mxu0 %v2626_v21  ;;  %v2696_v21 = vld [vmem:[#allocation16 + $0x240] ss:$8 sps:$4 sm:$0xff]  }
 0x18c   :  { %1393 = vmatprep.subr.bf16.mxu0 %v2631_v22  ;;  %v2701_v22 = vld [vmem:[#allocation16 + $0x254] ss:$8 sps:$4 sm:$0xff]  }
 0x18f   :  { %1394 = vmatpush1.bf16.msra.mxu0 %v2629_v25  ;;  %v2699_v25 = vld [vmem:[#allocation16 + $0x250] ss:$8 sps:$4 sm:$0xff]  }
 0x190   :  { %1395 = vmatprep.subr.bf16.mxu0 %v2634_v26  ;;  %v2704_v26 = vld [vmem:[#allocation16 + $0x264] ss:$8 sps:$4 sm:$0xff]  }
 0x193   :  { %1396 = vmatpush1.bf16.msra.mxu0 %v2632_v29  ;;  %v1358_v29 = vsel %vm1356_vm2, 65535, %v3103_v15 }
 0x194   :  { %1406 = vmatprep.subr.bf16.mxu0 %v2637_v30  ;;  %v2702_v30 = vld [vmem:[#allocation16 + $0x260] ss:$8 sps:$4 sm:$0xff]   ;;  %v1363_v32 = vand.u32 %v2224_v27, %v1358_v29 }
 0x195   :  { %v2732_v27 = vld [vmem:[#allocation20 + $0x8] sm:$0xff]  }
 0x196   :  { %1398 = vmatmul.mubr.bf16.vlgmr.msra.gmra.mrb[8].mxu0 %v861_v33  ;;  %v1360_v33 = vand.u32 %v2223_v31, %v1358_v29  ;;  %v2734_v29 = vld [vmem:[#allocation20 + $0x18] sm:$0xff]  }
 0x197   :  { %1407 = vmatpush1.bf16.msra.mxu0 %v2635_v34  ;;  %1438 = vmatprep.mubr.bf16.mxu0 %v864_v35  ;;  %v2144_v34 = vld.sshfl [vmem:[#allocation8 + $0x8] sm:$0x3 pattern:$0x76325410] }
 0x198   :  { %1408 = vmatprep.subr.bf16.mxu0 %v2640_v28  ;;  %v865_v35 = vpack.c.bf16 %v2144_v34, %v2144_v34 }
 0x19b   :  { %1409 = vmatpush1.bf16.msra.mxu0 %v2638_v37 }
 0x19c   :  { %1410 = vmatprep.subr.bf16.mxu0 %v2643_v38 }
 0x19f   :  { %1411 = vmatpush1.bf16.msra.mxu0 %v2641_v40 }
 0x1a0   :  { %1412 = vmatprep.subr.bf16.mxu0 %v2646_v41 }
 0x1a3   :  { %1413 = vmatpush1.bf16.msra.mxu0 %v2644_v43 }
 0x1a4   :  { %1414 = vmatprep.subr.bf16.mxu0 %v2649_v44 }
 0x1a7   :  { %1415 = vmatpush1.bf16.msra.mxu0 %v2647_v46 }
 0x1a8   :  { %1416 = vmatprep.subr.bf16.mxu0 %v2652_v47 }
 0x1ab   :  { %1417 = vmatpush1.bf16.msra.mxu0 %v2650_v48 }
 0x1ac   :  { %1418 = vmatprep.subr.bf16.mxu0 %v2655_v49 }
 0x1af   :  { %1419 = vmatpush1.bf16.msra.mxu0 %v2653_v51 }
 0x1b0   :  { %1420 = vmatprep.subr.bf16.mxu0 %v2658_v52 }
 0x1b3   :  { %1421 = vmatpush1.bf16.msra.mxu0 %v2656_v54 }
 0x1b4   :  { %1422 = vmatprep.subr.bf16.mxu0 %v2661_v55 }
 0x1b7   :  { %1423 = vmatpush1.bf16.msra.mxu0 %v2659_v57  ;;  %v2716_v57 = vld [vmem:[#allocation19] sm:$0xff]  }
 0x1b8   :  { %1424 = vmatprep.subr.bf16.mxu0 %v2664_v58 }
 0x1bb   :  { %1425 = vmatpush1.bf16.msra.mxu0 %v2662_v60  ;;  %v2718_v60 = vld [vmem:[#allocation19 + $0x8] sm:$0xff]  }
 0x1bc   :  { %1426 = vmatprep.subr.bf16.mxu0 %v2667_v61  ;;  %v2719_v61 = vld [vmem:[#allocation19 + $0x50] sm:$0xff]  }
 0x1bf   :  { %1427 = vmatpush1.bf16.msra.mxu0 %v2665_v62  ;;  %v2720_v62 = vld [vmem:[#allocation19 + $0x10] sm:$0xff]  }
 0x1c0   :  { %1428 = vmatprep.subr.bf16.mxu0 %v2670_v63  ;;  %v2721_v63 = vld [vmem:[#allocation19 + $0x58] sm:$0xff]  }
 0x1c3   :  { %1429 = vmatpush1.bf16.msra.mxu0 %v2668_v1  ;;  %v2722_v1 = vld [vmem:[#allocation19 + $0x18] sm:$0xff]  }
 0x1c4   :  { %1430 = vmatprep.subr.bf16.mxu0 %v2673_v2  ;;  %v2723_v2 = vld [vmem:[#allocation19 + $0x60] sm:$0xff]  }
 0x1c7   :  { %1431 = vmatpush1.bf16.msra.mxu0 %v2671_v3  ;;  %v2724_v3 = vld [vmem:[#allocation19 + $0x20] sm:$0xff]  }
 0x1c8   :  { %1432 = vmatprep.subr.bf16.mxu0 %v2676_v4  ;;  %v2725_v4 = vld [vmem:[#allocation19 + $0x68] sm:$0xff]  }
 0x1cb   :  { %1433 = vmatpush1.bf16.msra.mxu0 %v2674_v5  ;;  %v2726_v5 = vld [vmem:[#allocation19 + $0x28] sm:$0xff]  }
 0x1cc   :  { %1434 = vmatprep.subr.bf16.mxu0 %v2679_v6  ;;  %v2727_v6 = vld [vmem:[#allocation19 + $0x70] sm:$0xff]  }
 0x1cf   :  { %1435 = vmatpush1.bf16.msra.mxu0 %v2677_v7  ;;  %v2728_v7 = vld [vmem:[#allocation19 + $0x30] sm:$0xff]  }
 0x1d0   :  { %1436 = vmatprep.subr.bf16.mxu0 %v2682_v8  ;;  %v2729_v8 = vld [vmem:[#allocation19 + $0x78] sm:$0xff]  }
 0x1d3   :  { %1437 = vmatpush1.bf16.msra.mxu0 %v2680_v9  ;;  %v2730_v9 = vld [vmem:[#allocation19 + $0x38] sm:$0xff]  }
 0x1d4   :  { %1447 = vmatprep.subr.bf16.mxu0 %v2686_v10  ;;  %v949_v10 = vsub.s32 0, %v3422_v23 }
 0x1d6   :  { %1439 = vmatmul.mubr.bf16.vlgmr.msra.gmra.mrb[8].mxu0 %v863_v11  ;;  %v945_v11 = vld [vmem:[#allocation17] sm:$0x3] }
 0x1d7   :  { %1448 = vmatpush1.bf16.msra.mxu0 %v2684_v12  ;;  %1479 = vmatprep.mubr.bf16.mxu0 %v3103_v15  ;;  %v953_v12 = vsub.s32 1, %v3422_v23  ;;  %v2733_v23 = vld [vmem:[#allocation20 + $0x10] sm:$0xff]  }
 0x1d8   :  { %1449 = vmatprep.subr.bf16.mxu0 %v2689_v13  ;;  %v950_v13 = vrot.slane %v945_v11, %v949_v10 }
 0x1db   :  { %1450 = vmatpush1.bf16.msra.mxu0 %v2687_v14  ;;  %v954_v14 = vrot.slane %v945_v11, %v953_v12 }
 0x1dc   :  { %1451 = vmatprep.subr.bf16.mxu0 %v2692_v16 }
 0x1df   :  { %1452 = vmatpush1.bf16.msra.mxu0 %v2690_v17 }
 0x1e0   :  { %1453 = vmatprep.subr.bf16.mxu0 %v2695_v18 }
 0x1e3   :  { %1454 = vmatpush1.bf16.msra.mxu0 %v2693_v19 }
 0x1e4   :  { %1455 = vmatprep.subr.bf16.mxu0 %v2698_v20 }
 0x1e7   :  { %1456 = vmatpush1.bf16.msra.mxu0 %v2696_v21 }
 0x1e8   :  { %1457 = vmatprep.subr.bf16.mxu0 %v2701_v22 }
 0x1eb   :  { %1458 = vmatpush1.bf16.msra.mxu0 %v2699_v25  ;;  %v2731_v25 = vld [vmem:[#allocation20] sm:$0xff]  }
 0x1ec   :  { %1459 = vmatprep.subr.bf16.mxu0 %v2704_v26 }
 0x1ef   :  { %1460 = vmatpush1.bf16.msra.mxu0 %v2702_v30  ;;  %v2135_v30 = vld [vmem:[#allocation14] ss:$0 sm:$0xff] }
 0x1f0   :  { %1461 = vmatprep.subr.bf16.mxu0 %v1363_v32 }
 0x1f3   :  { %1462 = vmatpush1.bf16.msra.mxu0 %v1360_v33 }
 0x1f6   :  { %2225 = vmatmul.mubr.msk.bf16.vlgmr.msra.gmra.mrb[8].mxu0 %vm1352_vm3, %v865_v35 }
 0x209   :  { %v350_v28 = vpop.f32.mrb[0].mxu0  ;;  %v438_v37 = vpop.f32.mrb[0].mxu1 }
 0x20a   :  { %v2398_v36 = vpop.f32.mrb[1].mxu0  ;;  %v3539_v38 = vadd.f32 %v438_v37, %v350_v28  ;;  %v2418_v40 = vpop.f32.mrb[1].mxu1 }
 0x20b   :  { %v353_v39 = vpop.f32.mrb[2].mxu0  ;;  %v441_v42 = vpop.f32.mrb[2].mxu1  ;;  %v2735_v36 = vld [vmem:[%s3667_s15] sm:$0xff]   ;;  %v2737_v40 = vld [vmem:[%s3667_s15 + $0x10] sm:$0xff]  }
 0x20c   :  { %v2399_v41 = vpop.f32.mrb[3].mxu0  ;;  %v2419_v43 = vpop.f32.mrb[3].mxu1  ;;  %v2736_v39 = vld [vmem:[%s3667_s15 + $0x8] sm:$0xff]   ;;  %v2739_v42 = vld [vmem:[%s3667_s15 + $0x20] sm:$0xff]  }
 0x20d   :  { %v2738_v41 = vld [vmem:[%s3667_s15 + $0x18] sm:$0xff]   ;;  %v2740_v43 = vld [vmem:[%s3667_s15 + $0x28] sm:$0xff]  }
 0x211   :  { %v707_v44 = vpop.f32.mrb[4].mxu1 }
 0x212   :  { %v2426_v45 = vpop.f32.mrb[5].mxu1 }
 0x213   :  { %v710_v46 = vpop.f32.mrb[6].mxu1  ;;  %v2741_v45 = vld [vmem:[%s3667_s15 + $0x30] sm:$0xff]  }
 0x214   :  { %v2427_v47 = vpop.f32.mrb[7].mxu1 }
 0x215   :  { %v2742_v47 = vld [vmem:[%s3667_s15 + $0x38] sm:$0xff]  }
 0x229   :  { %v2308_v48 = vpop.f32.mrb[4].mxu0 }
 0x22a   :  { %v2309_v49 = vpop.f32.mrb[5].mxu0 }
 0x22b   :  { %v2310_v51 = vadd.f32 %v2309_v49, %v2308_v48  ;;  %v2311_v52 = vpop.f32.mrb[6].mxu0  ;;  %v2743_v49 = vld [vmem:[#allocation22] sm:$0xff]  }
 0x22c   :  { %v2312_v53 = vpop.f32.mrb[7].mxu0  ;;  %v2746_v52 = vld [vmem:[#allocation22 + $0x18] sm:$0xff]  }
 0x22d   :  { %v668_v54 = vadd.f32 %v2310_v51, %v2115_v50  ;;  %v2744_v51 = vld [vmem:[#allocation22 + $0x8] sm:$0xff]   ;;  %v2747_v53 = vld [vmem:[#allocation22 + $0x20] sm:$0xff]  }
 0x22f   :  { %v708_v55 = vadd.f32 %v707_v44, %v668_v54  ;;  %v2114_v44 = vld [vmem:[%s3658_s6] ss:$0 sm:$0xff] }
 0x230   :  { %v451_v46 = vadd.f32 %v2114_v44, %v3539_v38  ;;  %v2745_v38 = vld [vmem:[#allocation22 + $0x10] sm:$0xff]   ;;  %v2748_v54 = vld [vmem:[#allocation22 + $0x28] sm:$0xff]  }
 0x231   :  { %v713_v56 = vmax.f32 %v708_v55, 0.0  ;;  %v2749_v55 = vld [vmem:[#allocation22 + $0x30] sm:$0xff]  }
 0x232   :  { %v452_v48 = vmax.f32 %v451_v46, 0.0 }
 0x233   :  { %v714_v58 = vpack.c.bf16 %v713_v56, %v713_v56  ;;  %v2750_v56 = vld [vmem:[#allocation22 + $0x38] sm:$0xff]  }
 0x234   :  { %v453_v50 = vpack.c.bf16 %v452_v48, %v452_v48 }
 0x235   :  { %2445 = vmatmul.mubr.bf16.vlgmr.msra.gmra.mrb[8].mxu1 %v714_v58  ;;  %v2226_v58 = vld [vmem:[%s3666_s14] ss:$0 sm:$0xff] }
 0x236   :  { %2327 = vmatpush3.bf16.msra.mxu1 %v2716_v57 }
 0x237   :  { %2328 = vmatprep.subr.bf16.mxu1 %v2717_v59 }
 0x23a   :  { %2329 = vmatpush3.bf16.msra.mxu1 %v2718_v60 }
 0x23b   :  { %2330 = vmatprep.subr.bf16.mxu1 %v2719_v61 }
 0x23e   :  { %2331 = vmatpush3.bf16.msra.mxu1 %v2720_v62 }
 0x23f   :  { %2332 = vmatprep.subr.bf16.mxu1 %v2721_v63 }
 0x242   :  { %2333 = vmatpush3.bf16.msra.mxu1 %v2722_v1 }
 0x243   :  { %2334 = vmatprep.subr.bf16.mxu1 %v2723_v2  ;;  %v2751_v2 = vld [vmem:[%s3671_s19] sm:$0xff]  }
 0x246   :  { %2335 = vmatpush3.bf16.msra.mxu1 %v2724_v3 }
 0x247   :  { %2336 = vmatprep.subr.bf16.mxu1 %v2725_v4  ;;  %v2752_v4 = vld [vmem:[%s3671_s19 + $0x8] sm:$0xff]  }
 0x24a   :  { %2337 = vmatpush3.bf16.msra.mxu1 %v2726_v5  ;;  %v2753_v5 = vld [vmem:[%s3671_s19 + $0x10] sm:$0xff]  }
 0x24b   :  { %2338 = vmatprep.subr.bf16.mxu1 %v2727_v6  ;;  %v2754_v6 = vld [vmem:[%s3671_s19 + $0x18] sm:$0xff]  }
 0x24e   :  { %2339 = vmatpush3.bf16.msra.mxu1 %v2728_v7  ;;  %v2755_v7 = vld [vmem:[%s3671_s19 + $0x20] sm:$0xff]  }
 0x24f   :  { %2340 = vmatprep.subr.bf16.mxu1 %v2729_v8  ;;  %v2756_v8 = vld [vmem:[%s3671_s19 + $0x28] sm:$0xff]  }
 0x252   :  { %2341 = vmatpush3.bf16.msra.mxu1 %v2730_v9 }
 0x253   :  { %2448 = vmatprep.subr.bf16.mxu1 %v3100_v0 }
 0x2c9   :  { %v1481_v15 = vpop.f32.mrb[8].mxu0 }
 0x2ca   :  { %v2520_v16 = vadd.f32 %v1481_v15, %v950_v13  ;;  %v1483_v17 = vpop.f32.mrb[9].mxu0 }
 0x2cb   :  { %v2521_v18 = vadd.f32 %v1483_v17, %v954_v14  ;;  %v1485_v19 = vpop.f32.mrb[10].mxu0 }
 0x2cc   :  { %v1488_v20 = vmax.f32 %v2520_v16, 0.0  ;;  %v1486_v21 = vpop.f32.mrb[11].mxu0  ;;  %v2757_v16 = vld [vmem:[%s3671_s19 + $0x30] sm:$0xff]   ;;  %v2758_v19 = vld [vmem:[%s3671_s19 + $0x38] sm:$0xff]   ;;  %s2083_s19 = sshll.u32 %s3104_s24, 4  ;;  %s2084_s19 = int_to_ptr.vmem [resolvable:$true] %s2083_s19 }
 0x2cd   :  { %v1489_v22 = vmax.f32 %v2521_v18, 0.0  ;;  %v2264_v21 = vld [vmem:[%s3670_s18] ss:$0 sm:$0xff]  ;;  %s3045_s18 = scalar_lea.vmem %s2084_s19, 32  ;;  %p3050_p7 = scmp.lt.s32.totalorder %s2084_s19, %s2084_s19 }
 0x2ce   :  { %v1490_v26 = vpack.c.bf16 %v1488_v20, %v1488_v20  ;;  %p3046_p6 = scmp.ne.s32.totalorder %s2084_s19, %s3045_s18  ;;  %p3051_p8 = scmp.lt.s32.totalorder %s3045_s18, %s3045_s18 }
 0x2cf   :  { %v1491_v24 = vpack.c.bf16 %v1489_v22, %v1489_v22 }
 0x2d0   :  { %p3052_p9 = por %p3051_p8, %p3050_p7 }
 0x2d1   :  { %1659 = vmatprep.mubr.bf16.mxu1 %v1491_v24 }
 0x2d2   :  { %1660 = vmatmul.mubr.bf16.vlgmr.msra.gmra.mrb[12].mxu1 %v1490_v26  ;;  %p3053_p10 = pnand %p3052_p9, %p3046_p6 }
 0x2d3   :  { %2449 = vmatpush3.bf16.msra.mxu1 %v2731_v25  ;;  %2456 = vmatprep.mubr.msk.bf16.mxu1 %vm3101_vm0, %v3100_v0 }
 0x2d4   :  { %2450 = vmatprep.subr.bf16.mxu1 %v3100_v0 }
 0x2d7   :  { %2451 = vmatpush3.bf16.msra.mxu1 %v2732_v27 }
 0x2d8   :  { %2452 = vmatprep.subr.bf16.mxu1 %v3100_v0 }
 0x2db   :  { %2453 = vmatpush3.bf16.msra.mxu1 %v2733_v23 }
 0x2dc   :  { %2454 = vmatprep.subr.bf16.mxu1 %v3100_v0 }
 0x2df   :  { %2455 = vmatpush3.bf16.msra.mxu1 %v2734_v29 }
 0x2e0   :  { %2460 = vmatprep.subr.bf16.mxu1 %v3100_v0 }
 0x308   :  { %v820_v31 = vpop.f32.mrb[8].mxu1 }
 0x309   :  { %v821_v32 = vadd.f32 %v2135_v30, %v820_v31  ;;  %v2446_v33 = vpop.f32.mrb[9].mxu1 }
 0x30a   :  { %v823_v34 = vpop.f32.mrb[10].mxu1 }
 0x30b   :  { %v826_v35 = vmax.f32 %v821_v32, 0.0  ;;  %v2447_v28 = vpop.f32.mrb[11].mxu1 }
 0x30d   :  { %v827_v37 = vpack.c.bf16 %v826_v35, %v826_v35 }
 0x30f   :  { %2457 = vmatmul.mubr.msk.bf16.vlgmr.msra.gmra.mrb[16].mxu1 %vm1717_vm4, %v827_v37 }
 0x310   :  { %2461 = vmatpush3.bf16.msra.mxu1 %v2735_v36  ;;  %2476 = vmatprep.mubr.msk.bf16.mxu1 %vm3101_vm0, %v3100_v0 }
 0x311   :  { %2462 = vmatprep.subr.bf16.mxu1 %v3100_v0 }
 0x314   :  { %2463 = vmatpush3.bf16.msra.mxu1 %v2736_v39 }
 0x315   :  { %2464 = vmatprep.subr.bf16.mxu1 %v3100_v0 }
 0x318   :  { %2465 = vmatpush3.bf16.msra.mxu1 %v2737_v40 }
 0x319   :  { %2466 = vmatprep.subr.bf16.mxu1 %v3100_v0 }
 0x31c   :  { %2467 = vmatpush3.bf16.msra.mxu1 %v2738_v41 }
 0x31d   :  { %2468 = vmatprep.subr.bf16.mxu1 %v3100_v0 }
 0x320   :  { %2469 = vmatpush3.bf16.msra.mxu1 %v2739_v42 }
 0x321   :  { %2470 = vmatprep.subr.bf16.mxu1 %v3100_v0 }
 0x324   :  { %2471 = vmatpush3.bf16.msra.mxu1 %v2740_v43 }
 0x325   :  { %2472 = vmatprep.subr.bf16.mxu1 %v3100_v0 }
 0x328   :  { %2473 = vmatpush3.bf16.msra.mxu1 %v2741_v45 }
 0x329   :  { %2474 = vmatprep.subr.bf16.mxu1 %v3100_v0 }
 0x32c   :  { %2475 = vmatpush3.bf16.msra.mxu1 %v2742_v47 }
 0x32d   :  { %2480 = vmatprep.subr.bf16.mxu1 %v3100_v0 }
 0x32f   :  { %2477 = vmatmul.mubr.bf16.vlgmr.msra.gmra.mrb[20].mxu1 %v453_v50 }
 0x330   :  { %2481 = vmatpush3.bf16.msra.mxu1 %v2743_v49  ;;  %2496 = vmatprep.mubr.msk.bf16.mxu1 %vm3101_vm0, %v3100_v0 }
 0x331   :  { %2482 = vmatprep.subr.bf16.mxu1 %v3100_v0 }
 0x334   :  { %2483 = vmatpush3.bf16.msra.mxu1 %v2744_v51 }
 0x335   :  { %2484 = vmatprep.subr.bf16.mxu1 %v3100_v0 }
 0x338   :  { %2485 = vmatpush3.bf16.msra.mxu1 %v2745_v38 }
 0x339   :  { %2486 = vmatprep.subr.bf16.mxu1 %v3100_v0 }
 0x33c   :  { %2487 = vmatpush3.bf16.msra.mxu1 %v2746_v52 }
 0x33d   :  { %2488 = vmatprep.subr.bf16.mxu1 %v3100_v0 }
 0x340   :  { %2489 = vmatpush3.bf16.msra.mxu1 %v2747_v53 }
 0x341   :  { %2490 = vmatprep.subr.bf16.mxu1 %v3100_v0 }
 0x344   :  { %2491 = vmatpush3.bf16.msra.mxu1 %v2748_v54 }
 0x345   :  { %2492 = vmatprep.subr.bf16.mxu1 %v3100_v0 }
 0x348   :  { %2493 = vmatpush3.bf16.msra.mxu1 %v2749_v55 }
 0x349   :  { %2494 = vmatprep.subr.bf16.mxu1 %v3100_v0 }
 0x34c   :  { %2495 = vmatpush3.bf16.msra.mxu1 %v2750_v56 }
 0x34d   :  { %2500 = vmatprep.subr.bf16.mxu1 %v3100_v0 }
 0x3a5   :  { %v2342_v57 = vpop.f32.mrb[12].mxu1 }
 0x3a6   :  { %v2343_v59 = vpop.f32.mrb[13].mxu1 }
 0x3a7   :  { %v2344_v60 = vadd.f32 %v2343_v59, %v2342_v57  ;;  %v2345_v61 = vpop.f32.mrb[14].mxu1 }
 0x3a8   :  { %v2346_v62 = vpop.f32.mrb[15].mxu1 }
 0x3a9   :  { %v1662_v63 = vadd.f32 %v2344_v60, %v2226_v58 }
 0x3ab   :  { %v1667_v1 = vmax.f32 %v1662_v63, 0.0 }
 0x3ad   :  { %v1668_v3 = vpack.c.bf16 %v1667_v1, %v1667_v1 }
 0x3af   :  { %2497 = vmatmul.mubr.bf16.vlgmr.msra.gmra.mrb[24].mxu1 %v1668_v3 }
 0x3b0   :  { %2501 = vmatpush3.bf16.msra.mxu1 %v2751_v2  ;;  %2516 = vmatprep.mubr.msk.bf16.mxu1 %vm3101_vm0, %v3100_v0 }
 0x3b1   :  { %2502 = vmatprep.subr.bf16.mxu1 %v3100_v0 }
 0x3b4   :  { %2503 = vmatpush3.bf16.msra.mxu1 %v2752_v4 }
 0x3b5   :  { %2504 = vmatprep.subr.bf16.mxu1 %v3100_v0 }
 0x3b8   :  { %2505 = vmatpush3.bf16.msra.mxu1 %v2753_v5 }
 0x3b9   :  { %2506 = vmatprep.subr.bf16.mxu1 %v3100_v0 }
 0x3bc   :  { %2507 = vmatpush3.bf16.msra.mxu1 %v2754_v6 }
 0x3bd   :  { %2508 = vmatprep.subr.bf16.mxu1 %v3100_v0 }
 0x3c0   :  { %2509 = vmatpush3.bf16.msra.mxu1 %v2755_v7 }
 0x3c1   :  { %2510 = vmatprep.subr.bf16.mxu1 %v3100_v0 }
 0x3c4   :  { %2511 = vmatpush3.bf16.msra.mxu1 %v2756_v8 }
 0x3c5   :  { %2512 = vmatprep.subr.bf16.mxu1 %v3100_v0 }
 0x3c8   :  { %2513 = vmatpush3.bf16.msra.mxu1 %v2757_v16 }
 0x3c9   :  { %2514 = vmatprep.subr.bf16.mxu1 %v3100_v0  ;;  %v2265_v0 = vld [vmem:[%s3672_s20] ss:$0 sm:$0xff] }
 0x3cc   :  { %2515 = vmatpush3.bf16.msra.mxu1 %v2758_v19 }
 0x3e2   :  { %v1755_v9 = vpop.f32.mrb[16].mxu1 }
 0x3e3   :  { %v2458_v10 = vpop.f32.mrb[17].mxu1 }
 0x3e4   :  { %v1758_v11 = vpop.f32.mrb[18].mxu1 }
 0x3e5   :  { %v2459_v12 = vpop.f32.mrb[19].mxu1 }
 0x402   :  { %v1843_v13 = vpop.f32.mrb[20].mxu1 }
 0x403   :  { %v1844_v14 = vadd.f32 %v1843_v13, %v1755_v9  ;;  %v2478_v15 = vpop.f32.mrb[21].mxu1 }
 0x404   :  { %v1846_v17 = vpop.f32.mrb[22].mxu1 }
 0x405   :  { %v2479_v18 = vpop.f32.mrb[23].mxu1 }
 0x482   :  { %v1947_v20 = vpop.f32.mrb[24].mxu1 }
 0x483   :  { %v1953_v22 = vadd.f32 %v1947_v20, %v1844_v14  ;;  %v2498_v24 = vpop.f32.mrb[25].mxu1 }
 0x484   :  { %v1950_v25 = vpop.f32.mrb[26].mxu1 }
 0x485   :  { %v1961_v26 = vadd.f32 %v2264_v21, %v1953_v22  ;;  %v2499_v27 = vpop.f32.mrb[27].mxu1 }
 0x487   :  { %v1962_v23 = vmax.f32 %v1961_v26, 0.0 }
 0x489   :  { %v1963_v29 = vpack.c.bf16 %v1962_v23, %v1962_v23 }
 0x48b   :  { %2517 = vmatmul.mubr.bf16.vlgmr.msra.gmra.mrb[28].mxu1 %v1963_v29 }
 0x55e   :  { %v2069_v30 = vpop.f32.mrb[28].mxu1 }
 0x55f   :  { %v2070_v31 = vadd.f32 %v2265_v0, %v2069_v30  ;;  %v2518_v32 = vpop.f32.mrb[29].mxu1 }
 0x560   :  { %v2072_v33 = vpop.f32.mrb[30].mxu1 }
 0x561   :  { %v2519_v34 = vpop.f32.mrb[31].mxu1  ;;  %2076 = vst.msk [vmem:[#allocation23] sm:$0x3] %vm2075_vm5, %v2070_v31 }
 0x562   :  { %3056 = shalt.err (!%p3053_p10)
}
 0x563   :  { %s3694_s20 = sld [smem:[#allocation38_spill]] }
 0x569   :  { %s3057_s4 = scalar_lea.hbm %s3694_s20, 32 }
 0x56a   :  { %p3058_p11 = scmp.ne.s32.totalorder %s3694_s20, %s3057_s4  ;;  %p3061_p12 = scmp.lt.u32.totalorder %s3057_s4, %s3694_s20 }
 0x56c   :  { %p3063_p13 = pnand %p3061_p12, %p3058_p11 }
 0x56e   :  { %3066 = shalt.err (!%p3063_p13)
}
 0x56f   :  { %2086 = dma.vmem_to_hbm [thread:$0]  %s2084_s19, 32, %s3694_s20, [#allocation4]  }
 0x570   :  { %3081 = dma.done.wait [#allocation4], 32  }
 0x571   :  { %3082 = vsyncadd [#allocation4], 4294967264 }
 0x572   :  { %2090 = vsyncpa [#allocation3], 1 }
 0x573   :  { %2091 = vsyncpa [#allocation6], 1 }
 0x574   :  { %2092 = vsyncpa [#allocation9], 1 }
 0x575   :  { %2093 = vsyncpa [#allocation12], 1 }
 0x576   :  { %2094 = vsyncpa [#allocation15], 1 }
 0x577   :  { %2095 = vsyncpa [#allocation18], 1 }
 0x578   :  { %2096 = vsyncpa [#allocation21], 1 }
 0x579   :  { %2097 = vsyncpa [#allocation4], 1 }

</bundles_post_ra>
